<compile_context>
chip_gen: v7x
topology: tpu7x:2x2x1
jax: 0.10.0
libtpu: 0.0.40
codegen_flags: <defaults>
</compile_context>

<pallas_src>
import jax
import jax.numpy as jnp
from jax.experimental import pallas as pl
from jax.experimental.pallas import tpu as pltpu


# --------------------------------------------------------------------------- kernel
def _make_kernel(td, L4):
    """td depth slices per grid step; L4 = 4*H*W interleaved (hh, ww) lanes per slice."""

    def kernel(x_ref, w_ref, m_ref, b_ref, o_ref):
        # x_ref: (Cin, td*L4)   input, already duplicated along h and w (lane index = hh*2W+ww)
        # w_ref: (2, 4, Cout, Cin)  weights, [kd, kh*2+kw, co, ci]
        # m_ref: (4, td*L4)     exact 0/1 parity masks, row p selects lanes with (hh%2)*2+(ww%2)==p
        # b_ref: (Cout, 1)
        # o_ref: (Cout, 2*td*L4) flat NCDHW output slab for these td depth slices
        x = x_ref[...]
        m = m_ref[...]
        b = b_ref[...]

        # Four parity-masked copies of the input (exact: mask entries are 0.0 / 1.0).
        xz = [x * m[p:p + 1, :] for p in range(4)]

        for kd in range(2):
            acc = None
            for p in range(4):
                # K = Cin matmul; MXU is nowhere near a bottleneck here.
                r = jnp.dot(w_ref[kd, p], xz[p],
                            preferred_element_type=jnp.float32)
                acc = r if acc is None else acc + r
            y = (acc + b).astype(o_ref.dtype)            # (Cout, td*L4)
            # Place each depth slice at its interleaved output-depth position
            # (2*j + kd); lane offsets are multiples of L4 (128-aligned for the
            # common case L4 % 128 == 0) -> dense, unmasked stores.
            for j in range(td):
                o_ref[:, (2 * j + kd) * L4:(2 * j + kd + 1) * L4] = (
                    y[:, j * L4:(j + 1) * L4])

    return kernel


# ------------------------------------------------------------------------ tile sizing
def _pick_td(D, L4, cin, cout, itemsize, n_batch, target_step_bytes, max_unroll=64):
    """Pick the number of input depth slices per grid step.

    Hard constraints:
      * D % td == 0                       (exact tiling, no ragged blocks)
      * (td * L4) % 128 == 0  or td == D  (lane-dim BlockSpec divisibility)
    Preferences:
      * per-step (x + y) block bytes ~= target_step_bytes  (amortize ~0.35us/step)
      * keep >= 2 grid programs when the problem allows it (v7x megacore)
      * bounded store-loop unroll
    """
    per_d = L4 * itemsize * (cin + 2 * cout)       # x + y bytes per depth slice
    cap = max(1, min(int(target_step_bytes // max(per_d, 1)), D, max_unroll))
    valid = [td for td in range(1, D + 1)
             if D % td == 0 and ((td * L4) % 128 == 0 or td == D)]
    pref = [td for td in valid if n_batch * (D // td) >= 2] or valid
    under = [td for td in pref if td <= cap]
    return max(under) if under else min(pref)


def _vmem_limit_bytes(cin, cout, Lb, itemsize):
    """Generation-aware VMEM limit: enough for double-buffered blocks + temporaries,
    with headroom below the physical capacity (64 MiB on v7x, 128 MiB on v5e/v6e)."""
    xblk = cin * Lb * itemsize
    yblk = 2 * cout * Lb * itemsize
    mblk = 4 * Lb * itemsize
    temps = (5 * cin + 3 * cout) * Lb * itemsize   # masked input copies + accumulators
    need = 2 * (xblk + yblk) + mblk + temps + (2 << 20)
    try:
        cap = pltpu.get_tpu_info().vmem_capacity_bytes
    except Exception:
        cap = 64 << 20                              # v7x-safe assumption
    ceiling = max(32 << 20, min(cap - (16 << 20), 96 << 20))
    return int(min(max(int(1.5 * need), 32 << 20), ceiling))


# ----------------------------------------------------------------------------- wrapper
def upsample_conv_transpose3d(x, weight, bias, *, target_step_bytes=5 << 20):
    """ConvTranspose3d(kernel_size=2, stride=2) forward (PyTorch semantics).

    x      : (N, C_in, D, H, W)
    weight : (C_in, C_out, 2, 2, 2)   (PyTorch ConvTranspose3d weight layout)
    bias   : (C_out,)
    returns: (N, C_out, 2D, 2H, 2W)
    """
    N, Cin, D, H, W = x.shape
    Cout = weight.shape[1]
    L4 = 4 * H * W
    itemsize = jnp.dtype(x.dtype).itemsize

    td = _pick_td(D, L4, Cin, Cout, itemsize, N, target_step_bytes)
    Lb = td * L4
    grid = (N, D // td)

    # ---- XLA-side prep: touches only the 1x/4x input, never the 8x output ---------
    # x4[n, ci, d*L4 + (2h+kh)*2W + (2w+kw)] = x[n, ci, d, h, w]
    x4 = jnp.broadcast_to(x[:, :, :, :, None, :, None], (N, Cin, D, H, 2, W, 2))
    x4 = x4.reshape(N, Cin, D * L4)
    # wt[kd, kh*2+kw, co, ci] = weight[ci, co, kd, kh, kw]
    wt = jnp.transpose(weight, (2, 3, 4, 1, 0)).reshape(2, 4, Cout, Cin).astype(x.dtype)
    bt = bias.reshape(Cout, 1).astype(x.dtype)
    # Parity masks over the interleaved (hh, ww) lane index, tiled over td slices.
    hh = jnp.arange(2 * H)
    ww = jnp.arange(2 * W)
    pcode = ((hh % 2)[:, None] * 2 + (ww % 2)[None, :]).reshape(1, L4)
    masks = (pcode == jnp.arange(4)[:, None]).astype(x.dtype)          # (4, L4)
    masks = jnp.tile(masks, (1, td))                                   # (4, Lb)

    vmem_limit = _vmem_limit_bytes(Cin, Cout, Lb, itemsize)

    out_flat = pl.pallas_call(
        _make_kernel(td, L4),
        out_shape=jax.ShapeDtypeStruct((N, Cout, 2 * D * L4), x.dtype),
        grid_spec=pltpu.PrefetchScalarGridSpec(
            num_scalar_prefetch=0,
            grid=grid,
            in_specs=[
                pl.BlockSpec((None, Cin, Lb), lambda n, d: (n, 0, d)),
                pl.BlockSpec((2, 4, Cout, Cin), lambda n, d: (0, 0, 0, 0)),
                pl.BlockSpec((4, Lb), lambda n, d: (0, 0)),
                pl.BlockSpec((Cout, 1), lambda n, d: (0, 0)),
            ],
            out_specs=pl.BlockSpec((None, Cout, 2 * Lb), lambda n, d: (n, 0, d)),
        ),
        compiler_params=pltpu.CompilerParams(
            dimension_semantics=("parallel", "parallel"),
            vmem_limit_bytes=vmem_limit),
    )(x4, wt, masks, bt)

    # Free reshape: the flat last dim is already the interleaved (2D, 2H, 2W) order.
    return out_flat.reshape(N, Cout, 2 * D, 2 * H, 2 * W)


# --------------------------------------------------------------------------- reference
def _reference_conv_transpose3d(x, weight, bias):
    """Pure-JAX reference (same math, no Pallas) for validation."""
    N, Cin, D, H, W = x.shape
    Cout = weight.shape[1]
    y = jnp.einsum("ncdhw,cokij->nodkhiwj", x, weight)
    y = y.reshape(N, Cout, 2 * D, 2 * H, 2 * W)
    return y + bias[None, :, None, None, None]


if __name__ == "__main__":
    key = jax.random.PRNGKey(0)
    k1, k2, k3 = jax.random.split(key, 3)

    # Small shapes: batch=2, in_channels=4, out_channels=8, spatial D=H=W=8
    N, Cin, Cout, D, H, W = 2, 4, 8, 8, 8, 8

    x = jax.random.normal(k1, (N, Cin, D, H, W), dtype=jnp.float32)
    fan = Cin * 8
    bound = 1.0 / (fan ** 0.5)
    weight = jax.random.uniform(k2, (Cin, Cout, 2, 2, 2),
                                minval=-bound, maxval=bound, dtype=jnp.float32)
    bias = jax.random.uniform(k3, (Cout,), minval=-bound, maxval=bound,
                              dtype=jnp.float32)

    fn = jax.jit(upsample_conv_transpose3d)
    out = jax.block_until_ready(fn(x, weight, bias))

    ref = _reference_conv_transpose3d(x, weight, bias)
    assert out.shape == (N, Cout, 2 * D, 2 * H, 2 * W), out.shape
    # Loose-ish tolerance: the MXU f32 matmul pass-precision inside the kernel may
    # differ from the precision XLA picks for the f32 reference einsum; a tap/placement
    # bug would produce O(1) errors, far above this threshold.
    err = float(jnp.max(jnp.abs(out - ref)))
    assert err < 2e-2, f"mismatch vs reference: max abs err {err}"

    print("KERNEL_OK")
</pallas_src>

<mosaic_0001>
module attributes {stable_mosaic.version = 11 : i64} {
  func.func @kernel(%arg0: i32, %arg1: i32, %arg2: memref<1x4x2048xf32, #tpu.memory_space<vmem>>, %arg3: memref<2x4x8x4xf32, #tpu.memory_space<vmem>>, %arg4: memref<4x2048xf32, #tpu.memory_space<vmem>>, %arg5: memref<8x1xf32, #tpu.memory_space<vmem>>, %arg6: memref<1x8x4096xf32, #tpu.memory_space<vmem>>) attributes {dimension_semantics = [#tpu.dimension_semantics<parallel>, #tpu.dimension_semantics<parallel>], iteration_bounds = array<i64: 2, 1>, scalar_prefetch = 0 : i64, scratch_operands = 0 : i64, tpu.core_type = #tpu.core_type<tc>, window_params = [{transform_indices = @transform_0, window_bounds = array<i64: 1, 4, 2048>}, {pipeline_mode = #tpu.pipeline_mode<synchronous>, transform_indices = @transform_1, window_bounds = array<i64: 2, 4, 8, 4>}, {pipeline_mode = #tpu.pipeline_mode<synchronous>, transform_indices = @transform_2, window_bounds = array<i64: 4, 2048>}, {pipeline_mode = #tpu.pipeline_mode<synchronous>, transform_indices = @transform_3, window_bounds = array<i64: 8, 1>}, {transform_indices = @transform_4, window_bounds = array<i64: 1, 8, 4096>}]} {
    %c0 = arith.constant 0 : index
    %c0_0 = arith.constant 0 : index
    %c0_1 = arith.constant 0 : index
    %0 = vector.load %arg2[%c0, %c0_0, %c0_1] : memref<1x4x2048xf32, #tpu.memory_space<vmem>>, vector<1x4x2048xf32>
    %1 = vector.shape_cast %0 : vector<1x4x2048xf32> to vector<4x2048xf32>
    %c0_2 = arith.constant 0 : index
    %c0_3 = arith.constant 0 : index
    %2 = vector.load %arg4[%c0_2, %c0_3] : memref<4x2048xf32, #tpu.memory_space<vmem>>, vector<4x2048xf32>
    %c0_4 = arith.constant 0 : index
    %c0_5 = arith.constant 0 : index
    %3 = vector.load %arg5[%c0_4, %c0_5] : memref<8x1xf32, #tpu.memory_space<vmem>>, vector<8x1xf32>
    %4 = vector.extract_strided_slice %2 {offsets = [0, 0], sizes = [1, 2048], strides = [1, 1]} : vector<4x2048xf32> to vector<1x2048xf32>
    %5 = vector.broadcast %4 : vector<1x2048xf32> to vector<4x2048xf32>
    %6 = arith.mulf %1, %5 : vector<4x2048xf32>
    %7 = vector.extract_strided_slice %2 {offsets = [1, 0], sizes = [1, 2048], strides = [1, 1]} : vector<4x2048xf32> to vector<1x2048xf32>
    %8 = vector.broadcast %7 : vector<1x2048xf32> to vector<4x2048xf32>
    %9 = arith.mulf %1, %8 : vector<4x2048xf32>
    %10 = vector.extract_strided_slice %2 {offsets = [2, 0], sizes = [1, 2048], strides = [1, 1]} : vector<4x2048xf32> to vector<1x2048xf32>
    %11 = vector.broadcast %10 : vector<1x2048xf32> to vector<4x2048xf32>
    %12 = arith.mulf %1, %11 : vector<4x2048xf32>
    %13 = vector.extract_strided_slice %2 {offsets = [3, 0], sizes = [1, 2048], strides = [1, 1]} : vector<4x2048xf32> to vector<1x2048xf32>
    %14 = vector.broadcast %13 : vector<1x2048xf32> to vector<4x2048xf32>
    %15 = arith.mulf %1, %14 : vector<4x2048xf32>
    %c0_6 = arith.constant 0 : index
    %c0_7 = arith.constant 0 : index
    %c0_8 = arith.constant 0 : index
    %c0_9 = arith.constant 0 : index
    %16 = vector.load %arg3[%c0_6, %c0_7, %c0_8, %c0_9] : memref<2x4x8x4xf32, #tpu.memory_space<vmem>>, vector<1x1x8x4xf32>
    %17 = vector.shape_cast %16 : vector<1x1x8x4xf32> to vector<8x4xf32>
    %cst = arith.constant dense<0.000000e+00> : vector<8x2048xf32>
    %18 = tpu.matmul %17, %6, %cst {dimension_numbers = #tpu.dot_dimension_numbers<[1], [0], [0], [1], [0, 0, 1, 1], [], []>} : vector<8x4xf32>, vector<4x2048xf32>, vector<8x2048xf32> -> vector<8x2048xf32>
    %c0_10 = arith.constant 0 : index
    %c1 = arith.constant 1 : index
    %c0_11 = arith.constant 0 : index
    %c0_12 = arith.constant 0 : index
    %19 = vector.load %arg3[%c0_10, %c1, %c0_11, %c0_12] : memref<2x4x8x4xf32, #tpu.memory_space<vmem>>, vector<1x1x8x4xf32>
    %20 = vector.shape_cast %19 : vector<1x1x8x4xf32> to vector<8x4xf32>
    %cst_13 = arith.constant dense<0.000000e+00> : vector<8x2048xf32>
    %21 = tpu.matmul %20, %9, %cst_13 {dimension_numbers = #tpu.dot_dimension_numbers<[1], [0], [0], [1], [0, 0, 1, 1], [], []>} : vector<8x4xf32>, vector<4x2048xf32>, vector<8x2048xf32> -> vector<8x2048xf32>
    %22 = arith.addf %18, %21 : vector<8x2048xf32>
    %c0_14 = arith.constant 0 : index
    %c2 = arith.constant 2 : index
    %c0_15 = arith.constant 0 : index
    %c0_16 = arith.constant 0 : index
    %23 = vector.load %arg3[%c0_14, %c2, %c0_15, %c0_16] : memref<2x4x8x4xf32, #tpu.memory_space<vmem>>, vector<1x1x8x4xf32>
    %24 = vector.shape_cast %23 : vector<1x1x8x4xf32> to vector<8x4xf32>
    %cst_17 = arith.constant dense<0.000000e+00> : vector<8x2048xf32>
    %25 = tpu.matmul %24, %12, %cst_17 {dimension_numbers = #tpu.dot_dimension_numbers<[1], [0], [0], [1], [0, 0, 1, 1], [], []>} : vector<8x4xf32>, vector<4x2048xf32>, vector<8x2048xf32> -> vector<8x2048xf32>
    %26 = arith.addf %22, %25 : vector<8x2048xf32>
    %c0_18 = arith.constant 0 : index
    %c3 = arith.constant 3 : index
    %c0_19 = arith.constant 0 : index
    %c0_20 = arith.constant 0 : index
    %27 = vector.load %arg3[%c0_18, %c3, %c0_19, %c0_20] : memref<2x4x8x4xf32, #tpu.memory_space<vmem>>, vector<1x1x8x4xf32>
    %28 = vector.shape_cast %27 : vector<1x1x8x4xf32> to vector<8x4xf32>
    %cst_21 = arith.constant dense<0.000000e+00> : vector<8x2048xf32>
    %29 = tpu.matmul %28, %15, %cst_21 {dimension_numbers = #tpu.dot_dimension_numbers<[1], [0], [0], [1], [0, 0, 1, 1], [], []>} : vector<8x4xf32>, vector<4x2048xf32>, vector<8x2048xf32> -> vector<8x2048xf32>
    %30 = arith.addf %26, %29 : vector<8x2048xf32>
    %31 = vector.broadcast %3 : vector<8x1xf32> to vector<8x2048xf32>
    %32 = arith.addf %30, %31 : vector<8x2048xf32>
    %33 = vector.extract_strided_slice %32 {offsets = [0, 0], sizes = [8, 256], strides = [1, 1]} : vector<8x2048xf32> to vector<8x256xf32>
    %c0_22 = arith.constant 0 : index
    %c0_23 = arith.constant 0 : index
    %c0_24 = arith.constant 0 : index
    %34 = vector.load %arg6[%c0_22, %c0_23, %c0_24] : memref<1x8x4096xf32, #tpu.memory_space<vmem>>, vector<1x8x256xf32>
    %35 = vector.shape_cast %34 : vector<1x8x256xf32> to vector<8x256xf32>
    %36 = vector.shape_cast %33 : vector<8x256xf32> to vector<1x8x256xf32>
    tpu.vector_store %arg6[%c0_22, %c0_23, %c0_24], %36 {strides = array<i32>} : memref<1x8x4096xf32, #tpu.memory_space<vmem>>, vector<1x8x256xf32>,
    %37 = vector.extract_strided_slice %32 {offsets = [0, 256], sizes = [8, 256], strides = [1, 1]} : vector<8x2048xf32> to vector<8x256xf32>
    %c0_25 = arith.constant 0 : index
    %c0_26 = arith.constant 0 : index
    %c512 = arith.constant 512 : index
    %38 = vector.load %arg6[%c0_25, %c0_26, %c512] : memref<1x8x4096xf32, #tpu.memory_space<vmem>>, vector<1x8x256xf32>
    %39 = vector.shape_cast %38 : vector<1x8x256xf32> to vector<8x256xf32>
    %40 = vector.shape_cast %37 : vector<8x256xf32> to vector<1x8x256xf32>
    tpu.vector_store %arg6[%c0_25, %c0_26, %c512], %40 {strides = array<i32>} : memref<1x8x4096xf32, #tpu.memory_space<vmem>>, vector<1x8x256xf32>,
    %41 = vector.extract_strided_slice %32 {offsets = [0, 512], sizes = [8, 256], strides = [1, 1]} : vector<8x2048xf32> to vector<8x256xf32>
    %c0_27 = arith.constant 0 : index
    %c0_28 = arith.constant 0 : index
    %c1024 = arith.constant 1024 : index
    %42 = vector.load %arg6[%c0_27, %c0_28, %c1024] : memref<1x8x4096xf32, #tpu.memory_space<vmem>>, vector<1x8x256xf32>
    %43 = vector.shape_cast %42 : vector<1x8x256xf32> to vector<8x256xf32>
    %44 = vector.shape_cast %41 : vector<8x256xf32> to vector<1x8x256xf32>
    tpu.vector_store %arg6[%c0_27, %c0_28, %c1024], %44 {strides = array<i32>} : memref<1x8x4096xf32, #tpu.memory_space<vmem>>, vector<1x8x256xf32>,
    %45 = vector.extract_strided_slice %32 {offsets = [0, 768], sizes = [8, 256], strides = [1, 1]} : vector<8x2048xf32> to vector<8x256xf32>
    %c0_29 = arith.constant 0 : index
    %c0_30 = arith.constant 0 : index
    %c1536 = arith.constant 1536 : index
    %46 = vector.load %arg6[%c0_29, %c0_30, %c1536] : memref<1x8x4096xf32, #tpu.memory_space<vmem>>, vector<1x8x256xf32>
    %47 = vector.shape_cast %46 : vector<1x8x256xf32> to vector<8x256xf32>
    %48 = vector.shape_cast %45 : vector<8x256xf32> to vector<1x8x256xf32>
    tpu.vector_store %arg6[%c0_29, %c0_30, %c1536], %48 {strides = array<i32>} : memref<1x8x4096xf32, #tpu.memory_space<vmem>>, vector<1x8x256xf32>,
    %49 = vector.extract_strided_slice %32 {offsets = [0, 1024], sizes = [8, 256], strides = [1, 1]} : vector<8x2048xf32> to vector<8x256xf32>
    %c0_31 = arith.constant 0 : index
    %c0_32 = arith.constant 0 : index
    %c2048 = arith.constant 2048 : index
    %50 = vector.load %arg6[%c0_31, %c0_32, %c2048] : memref<1x8x4096xf32, #tpu.memory_space<vmem>>, vector<1x8x256xf32>
    %51 = vector.shape_cast %50 : vector<1x8x256xf32> to vector<8x256xf32>
    %52 = vector.shape_cast %49 : vector<8x256xf32> to vector<1x8x256xf32>
    tpu.vector_store %arg6[%c0_31, %c0_32, %c2048], %52 {strides = array<i32>} : memref<1x8x4096xf32, #tpu.memory_space<vmem>>, vector<1x8x256xf32>,
    %53 = vector.extract_strided_slice %32 {offsets = [0, 1280], sizes = [8, 256], strides = [1, 1]} : vector<8x2048xf32> to vector<8x256xf32>
    %c0_33 = arith.constant 0 : index
    %c0_34 = arith.constant 0 : index
    %c2560 = arith.constant 2560 : index
    %54 = vector.load %arg6[%c0_33, %c0_34, %c2560] : memref<1x8x4096xf32, #tpu.memory_space<vmem>>, vector<1x8x256xf32>
    %55 = vector.shape_cast %54 : vector<1x8x256xf32> to vector<8x256xf32>
    %56 = vector.shape_cast %53 : vector<8x256xf32> to vector<1x8x256xf32>
    tpu.vector_store %arg6[%c0_33, %c0_34, %c2560], %56 {strides = array<i32>} : memref<1x8x4096xf32, #tpu.memory_space<vmem>>, vector<1x8x256xf32>,
    %57 = vector.extract_strided_slice %32 {offsets = [0, 1536], sizes = [8, 256], strides = [1, 1]} : vector<8x2048xf32> to vector<8x256xf32>
    %c0_35 = arith.constant 0 : index
    %c0_36 = arith.constant 0 : index
    %c3072 = arith.constant 3072 : index
    %58 = vector.load %arg6[%c0_35, %c0_36, %c3072] : memref<1x8x4096xf32, #tpu.memory_space<vmem>>, vector<1x8x256xf32>
    %59 = vector.shape_cast %58 : vector<1x8x256xf32> to vector<8x256xf32>
    %60 = vector.shape_cast %57 : vector<8x256xf32> to vector<1x8x256xf32>
    tpu.vector_store %arg6[%c0_35, %c0_36, %c3072], %60 {strides = array<i32>} : memref<1x8x4096xf32, #tpu.memory_space<vmem>>, vector<1x8x256xf32>,
    %61 = vector.extract_strided_slice %32 {offsets = [0, 1792], sizes = [8, 256], strides = [1, 1]} : vector<8x2048xf32> to vector<8x256xf32>
    %c0_37 = arith.constant 0 : index
    %c0_38 = arith.constant 0 : index
    %c3584 = arith.constant 3584 : index
    %62 = vector.load %arg6[%c0_37, %c0_38, %c3584] : memref<1x8x4096xf32, #tpu.memory_space<vmem>>, vector<1x8x256xf32>
    %63 = vector.shape_cast %62 : vector<1x8x256xf32> to vector<8x256xf32>
    %64 = vector.shape_cast %61 : vector<8x256xf32> to vector<1x8x256xf32>
    tpu.vector_store %arg6[%c0_37, %c0_38, %c3584], %64 {strides = array<i32>} : memref<1x8x4096xf32, #tpu.memory_space<vmem>>, vector<1x8x256xf32>,
    %c1_39 = arith.constant 1 : index
    %c0_40 = arith.constant 0 : index
    %c0_41 = arith.constant 0 : index
    %c0_42 = arith.constant 0 : index
    %65 = vector.load %arg3[%c1_39, %c0_40, %c0_41, %c0_42] : memref<2x4x8x4xf32, #tpu.memory_space<vmem>>, vector<1x1x8x4xf32>
    %66 = vector.shape_cast %65 : vector<1x1x8x4xf32> to vector<8x4xf32>
    %cst_43 = arith.constant dense<0.000000e+00> : vector<8x2048xf32>
    %67 = tpu.matmul %66, %6, %cst_43 {dimension_numbers = #tpu.dot_dimension_numbers<[1], [0], [0], [1], [0, 0, 1, 1], [], []>} : vector<8x4xf32>, vector<4x2048xf32>, vector<8x2048xf32> -> vector<8x2048xf32>
    %c1_44 = arith.constant 1 : index
    %c1_45 = arith.constant 1 : index
    %c0_46 = arith.constant 0 : index
    %c0_47 = arith.constant 0 : index
    %68 = vector.load %arg3[%c1_44, %c1_45, %c0_46, %c0_47] : memref<2x4x8x4xf32, #tpu.memory_space<vmem>>, vector<1x1x8x4xf32>
    %69 = vector.shape_cast %68 : vector<1x1x8x4xf32> to vector<8x4xf32>
    %cst_48 = arith.constant dense<0.000000e+00> : vector<8x2048xf32>
    %70 = tpu.matmul %69, %9, %cst_48 {dimension_numbers = #tpu.dot_dimension_numbers<[1], [0], [0], [1], [0, 0, 1, 1], [], []>} : vector<8x4xf32>, vector<4x2048xf32>, vector<8x2048xf32> -> vector<8x2048xf32>
    %71 = arith.addf %67, %70 : vector<8x2048xf32>
    %c1_49 = arith.constant 1 : index
    %c2_50 = arith.constant 2 : index
    %c0_51 = arith.constant 0 : index
    %c0_52 = arith.constant 0 : index
    %72 = vector.load %arg3[%c1_49, %c2_50, %c0_51, %c0_52] : memref<2x4x8x4xf32, #tpu.memory_space<vmem>>, vector<1x1x8x4xf32>
    %73 = vector.shape_cast %72 : vector<1x1x8x4xf32> to vector<8x4xf32>
    %cst_53 = arith.constant dense<0.000000e+00> : vector<8x2048xf32>
    %74 = tpu.matmul %73, %12, %cst_53 {dimension_numbers = #tpu.dot_dimension_numbers<[1], [0], [0], [1], [0, 0, 1, 1], [], []>} : vector<8x4xf32>, vector<4x2048xf32>, vector<8x2048xf32> -> vector<8x2048xf32>
    %75 = arith.addf %71, %74 : vector<8x2048xf32>
    %c1_54 = arith.constant 1 : index
    %c3_55 = arith.constant 3 : index
    %c0_56 = arith.constant 0 : index
    %c0_57 = arith.constant 0 : index
    %76 = vector.load %arg3[%c1_54, %c3_55, %c0_56, %c0_57] : memref<2x4x8x4xf32, #tpu.memory_space<vmem>>, vector<1x1x8x4xf32>
    %77 = vector.shape_cast %76 : vector<1x1x8x4xf32> to vector<8x4xf32>
    %cst_58 = arith.constant dense<0.000000e+00> : vector<8x2048xf32>
    %78 = tpu.matmul %77, %15, %cst_58 {dimension_numbers = #tpu.dot_dimension_numbers<[1], [0], [0], [1], [0, 0, 1, 1], [], []>} : vector<8x4xf32>, vector<4x2048xf32>, vector<8x2048xf32> -> vector<8x2048xf32>
    %79 = arith.addf %75, %78 : vector<8x2048xf32>
    %80 = vector.broadcast %3 : vector<8x1xf32> to vector<8x2048xf32>
    %81 = arith.addf %79, %80 : vector<8x2048xf32>
    %82 = vector.extract_strided_slice %81 {offsets = [0, 0], sizes = [8, 256], strides = [1, 1]} : vector<8x2048xf32> to vector<8x256xf32>
    %c0_59 = arith.constant 0 : index
    %c0_60 = arith.constant 0 : index
    %c256 = arith.constant 256 : index
    %83 = vector.load %arg6[%c0_59, %c0_60, %c256] : memref<1x8x4096xf32, #tpu.memory_space<vmem>>, vector<1x8x256xf32>
    %84 = vector.shape_cast %83 : vector<1x8x256xf32> to vector<8x256xf32>
    %85 = vector.shape_cast %82 : vector<8x256xf32> to vector<1x8x256xf32>
    tpu.vector_store %arg6[%c0_59, %c0_60, %c256], %85 {strides = array<i32>} : memref<1x8x4096xf32, #tpu.memory_space<vmem>>, vector<1x8x256xf32>,
    %86 = vector.extract_strided_slice %81 {offsets = [0, 256], sizes = [8, 256], strides = [1, 1]} : vector<8x2048xf32> to vector<8x256xf32>
    %c0_61 = arith.constant 0 : index
    %c0_62 = arith.constant 0 : index
    %c768 = arith.constant 768 : index
    %87 = vector.load %arg6[%c0_61, %c0_62, %c768] : memref<1x8x4096xf32, #tpu.memory_space<vmem>>, vector<1x8x256xf32>
    %88 = vector.shape_cast %87 : vector<1x8x256xf32> to vector<8x256xf32>
    %89 = vector.shape_cast %86 : vector<8x256xf32> to vector<1x8x256xf32>
    tpu.vector_store %arg6[%c0_61, %c0_62, %c768], %89 {strides = array<i32>} : memref<1x8x4096xf32, #tpu.memory_space<vmem>>, vector<1x8x256xf32>,
    %90 = vector.extract_strided_slice %81 {offsets = [0, 512], sizes = [8, 256], strides = [1, 1]} : vector<8x2048xf32> to vector<8x256xf32>
    %c0_63 = arith.constant 0 : index
    %c0_64 = arith.constant 0 : index
    %c1280 = arith.constant 1280 : index
    %91 = vector.load %arg6[%c0_63, %c0_64, %c1280] : memref<1x8x4096xf32, #tpu.memory_space<vmem>>, vector<1x8x256xf32>
    %92 = vector.shape_cast %91 : vector<1x8x256xf32> to vector<8x256xf32>
    %93 = vector.shape_cast %90 : vector<8x256xf32> to vector<1x8x256xf32>
    tpu.vector_store %arg6[%c0_63, %c0_64, %c1280], %93 {strides = array<i32>} : memref<1x8x4096xf32, #tpu.memory_space<vmem>>, vector<1x8x256xf32>,
    %94 = vector.extract_strided_slice %81 {offsets = [0, 768], sizes = [8, 256], strides = [1, 1]} : vector<8x2048xf32> to vector<8x256xf32>
    %c0_65 = arith.constant 0 : index
    %c0_66 = arith.constant 0 : index
    %c1792 = arith.constant 1792 : index
    %95 = vector.load %arg6[%c0_65, %c0_66, %c1792] : memref<1x8x4096xf32, #tpu.memory_space<vmem>>, vector<1x8x256xf32>
    %96 = vector.shape_cast %95 : vector<1x8x256xf32> to vector<8x256xf32>
    %97 = vector.shape_cast %94 : vector<8x256xf32> to vector<1x8x256xf32>
    tpu.vector_store %arg6[%c0_65, %c0_66, %c1792], %97 {strides = array<i32>} : memref<1x8x4096xf32, #tpu.memory_space<vmem>>, vector<1x8x256xf32>,
    %98 = vector.extract_strided_slice %81 {offsets = [0, 1024], sizes = [8, 256], strides = [1, 1]} : vector<8x2048xf32> to vector<8x256xf32>
    %c0_67 = arith.constant 0 : index
    %c0_68 = arith.constant 0 : index
    %c2304 = arith.constant 2304 : index
    %99 = vector.load %arg6[%c0_67, %c0_68, %c2304] : memref<1x8x4096xf32, #tpu.memory_space<vmem>>, vector<1x8x256xf32>
    %100 = vector.shape_cast %99 : vector<1x8x256xf32> to vector<8x256xf32>
    %101 = vector.shape_cast %98 : vector<8x256xf32> to vector<1x8x256xf32>
    tpu.vector_store %arg6[%c0_67, %c0_68, %c2304], %101 {strides = array<i32>} : memref<1x8x4096xf32, #tpu.memory_space<vmem>>, vector<1x8x256xf32>,
    %102 = vector.extract_strided_slice %81 {offsets = [0, 1280], sizes = [8, 256], strides = [1, 1]} : vector<8x2048xf32> to vector<8x256xf32>
    %c0_69 = arith.constant 0 : index
    %c0_70 = arith.constant 0 : index
    %c2816 = arith.constant 2816 : index
    %103 = vector.load %arg6[%c0_69, %c0_70, %c2816] : memref<1x8x4096xf32, #tpu.memory_space<vmem>>, vector<1x8x256xf32>
    %104 = vector.shape_cast %103 : vector<1x8x256xf32> to vector<8x256xf32>
    %105 = vector.shape_cast %102 : vector<8x256xf32> to vector<1x8x256xf32>
    tpu.vector_store %arg6[%c0_69, %c0_70, %c2816], %105 {strides = array<i32>} : memref<1x8x4096xf32, #tpu.memory_space<vmem>>, vector<1x8x256xf32>,
    %106 = vector.extract_strided_slice %81 {offsets = [0, 1536], sizes = [8, 256], strides = [1, 1]} : vector<8x2048xf32> to vector<8x256xf32>
    %c0_71 = arith.constant 0 : index
    %c0_72 = arith.constant 0 : index
    %c3328 = arith.constant 3328 : index
    %107 = vector.load %arg6[%c0_71, %c0_72, %c3328] : memref<1x8x4096xf32, #tpu.memory_space<vmem>>, vector<1x8x256xf32>
    %108 = vector.shape_cast %107 : vector<1x8x256xf32> to vector<8x256xf32>
    %109 = vector.shape_cast %106 : vector<8x256xf32> to vector<1x8x256xf32>
    tpu.vector_store %arg6[%c0_71, %c0_72, %c3328], %109 {strides = array<i32>} : memref<1x8x4096xf32, #tpu.memory_space<vmem>>, vector<1x8x256xf32>,
    %110 = vector.extract_strided_slice %81 {offsets = [0, 1792], sizes = [8, 256], strides = [1, 1]} : vector<8x2048xf32> to vector<8x256xf32>
    %c0_73 = arith.constant 0 : index
    %c0_74 = arith.constant 0 : index
    %c3840 = arith.constant 3840 : index
    %111 = vector.load %arg6[%c0_73, %c0_74, %c3840] : memref<1x8x4096xf32, #tpu.memory_space<vmem>>, vector<1x8x256xf32>
    %112 = vector.shape_cast %111 : vector<1x8x256xf32> to vector<8x256xf32>
    %113 = vector.shape_cast %110 : vector<8x256xf32> to vector<1x8x256xf32>
    tpu.vector_store %arg6[%c0_73, %c0_74, %c3840], %113 {strides = array<i32>} : memref<1x8x4096xf32, #tpu.memory_space<vmem>>, vector<1x8x256xf32>,
    return
  }
  func.func @transform_0(%arg0: i32, %arg1: i32) -> (i32, i32, i32) {
    %c0_i32 = arith.constant 0 : i32
    %c0_i32_0 = arith.constant 0 : i32
    return %arg0, %c0_i32, %arg1 : i32, i32, i32
  }
  func.func @transform_1(%arg0: i32, %arg1: i32) -> (i32, i32, i32, i32) {
    %c0_i32 = arith.constant 0 : i32
    %c0_i32_0 = arith.constant 0 : i32
    %c0_i32_1 = arith.constant 0 : i32
    %c0_i32_2 = arith.constant 0 : i32
    %c0_i32_3 = arith.constant 0 : i32
    return %c0_i32, %c0_i32_0, %c0_i32_1, %c0_i32_2 : i32, i32, i32, i32
  }
  func.func @transform_2(%arg0: i32, %arg1: i32) -> (i32, i32) {
    %c0_i32 = arith.constant 0 : i32
    %c0_i32_0 = arith.constant 0 : i32
    %c0_i32_1 = arith.constant 0 : i32
    return %c0_i32, %c0_i32_0 : i32, i32
  }
  func.func @transform_3(%arg0: i32, %arg1: i32) -> (i32, i32) {
    %c0_i32 = arith.constant 0 : i32
    %c0_i32_0 = arith.constant 0 : i32
    %c0_i32_1 = arith.constant 0 : i32
    return %c0_i32, %c0_i32_0 : i32, i32
  }
  func.func @transform_4(%arg0: i32, %arg1: i32) -> (i32, i32, i32) {
    %c0_i32 = arith.constant 0 : i32
    %c0_i32_0 = arith.constant 0 : i32
    return %arg0, %c0_i32, %arg1 : i32, i32, i32
  }
}

</mosaic_0001>

<bundles_post_ra>
// kernel: upsample_conv_transpose3d.1
= control target key start
LH: loop header
LB: loop body
LE: loop exit
PB: predicated region body
PF: predicated region fallthrough
CT: control target
= control target key end

     0   :  { %s6381_s15 = smov 0   ;;  %s6383_s16 = smov 0   ;;  %s7445_s0 = inlined_call_operand.vmem [shape: f32[2,4,2048], index: 0, kind: input, shape index: {}]   ;;  %s7446_s1 = inlined_call_operand.vmem [shape: f32[2,4,8,4], index: 1, kind: input, shape index: {}]   ;;  %s7447_s2 = inlined_call_operand.vmem [shape: f32[4,2048], index: 2, kind: input, shape index: {}]   ;;  %s7448_s3 = inlined_call_operand.vmem [shape: f32[8,1], index: 3, kind: input, shape index: {}]   ;;  %s7449_s4 = inlined_call_operand.vmem [shape: f32[2,8,4096], index: 4, kind: output, shape index: {}]  }
   0x1   :  { %s6385_s17 = smov 0  }
   0x2 LB: > { %s26_s18 = sadd.s32 1, %s6348_s16  ;;  %p5999_p0 = scmp.ge.s32.totalorder %s6352_s17, 1  ;;  %s6352_s17 = sphi %s6385_s17, %s14_s17   ;;  %s6348_s16 = sphi %s6383_s16, %s7493_s16   ;;  %s6344_s15 = sphi %s6381_s15, %s7492_s15  }
   0x3   : > { %p28_p1 = scmp.ge.s32.totalorder %s26_s18, 2  ;;  %p183_p2 = scmp.lt.s32.totalorder %s6352_s17, 3 }
   0x5   : > { %s7495_s18 = smov (%p28_p1, %s26_s18), 0  ;;  %p184_p3 = pnand %p5999_p0, %p183_p2 }
   0x7   : > { %187 = sbr.rel (%p184_p3) target bundleno = 379 (0x17b), region = 36 }
   0xe   : > { %p218_p4 = scmp.lt.s32.totalorder %s6344_s15, 1  ;;  %v262_v0 = vlaneseq  ;;  %v7451_v1 = vmov 0.0   ;;  %v6408_v3 = vld [vmem:[%s7447_s2] sm:$0xff]  ;;  %v6413_v4 = vld [vmem:[%s7447_s2 + $0x8] sm:$0xff]  ;;  %v6425_v7 = vld [vmem:[%s7447_s2 + $0x10] sm:$0xff]  ;;  %vm1021_vm0 = vcmask 1043456  }
   0xf   : > { %1118 = vmatprep.mubr.f32.mxu0 %v7451_v1  ;;  %1189 = vmatprep.mubr.f32.mxu1 %v7451_v1  ;;  %v6430_v8 = vld [vmem:[%s7447_s2 + $0x18] sm:$0xff]  ;;  %vm1017_vm1 = vcmask 31744   ;;  %v6459_v18 = vld [vmem:[%s7447_s2 + $0x20] sm:$0xff]  ;;  %v6468_v23 = vld [vmem:[%s7447_s2 + $0x28] sm:$0xff] }
  0x10   : > { %s7497_s15 = smov (!%p218_p4, %s6344_s15), 1  ;;  %v6403_v2 = vshrl.u32 %v262_v0, 7  ;;  %v6497_v40 = vld [vmem:[%s7447_s2 + $0x30] sm:$0xff]  ;;  %v6521_v50 = vld [vmem:[%s7447_s2 + $0x38] sm:$0xff]  ;;  %v6539_v56 = vld [vmem:[%s7446_s1 + $0x8] sm:$0xff] }
  0x11   : > { %s6205_s23 = sshll.u32 %s7497_s15, 6  ;;  %s6206_s9 = sshll.u32 %s7497_s15, 8 }
  0x12   : > { %v6417_v5 = vsub.s32 1, %v6403_v2  ;;  %v6420_v6 = vsub.s32 5, %v6403_v2  ;;  %v6433_v9 = vsub.s32 0, %v6403_v2  ;;  %s6438_s30 = scalar_lea.vmem %s7445_s0, %s6205_s23  ;;  %v6562_v0 = vsub.s32 4, %v6403_v2  ;;  %s7370_s12 = scalar_lea.vmem %s7449_s4, %s6206_s9 }
  0x13   : > { %v6471_v24 = vld [vmem:[%s6438_s30] sm:$0xff]  ;;  %v6474_v25 = vld [vmem:[%s6438_s30 + $0x8] sm:$0xff]  ;;  %v6481_v32 = vld [vmem:[%s6438_s30 + $0x10] sm:$0xff] }
  0x14   : > { %v449_v10 = vrot.slane %v6408_v3, %v6417_v5  ;;  %v453_v11 = vrot.slane %v6408_v3, %v6420_v6  ;;  %v457_v12 = vrot.slane %v6413_v4, %v6417_v5  ;;  %v461_v13 = vrot.slane %v6413_v4, %v6420_v6  ;;  %v6484_v33 = vld [vmem:[%s6438_s30 + $0x18] sm:$0xff]  ;;  %v6514_v47 = vld [vmem:[%s6438_s30 + $0x20] sm:$0xff]  ;;  %v6532_v54 = vld [vmem:[%s6438_s30 + $0x28] sm:$0xff] }
  0x15   : > { %v465_v14 = vrot.slane %v6425_v7, %v6417_v5  ;;  %v469_v15 = vrot.slane %v6425_v7, %v6420_v6  ;;  %v473_v16 = vrot.slane %v6430_v8, %v6417_v5  ;;  %v477_v17 = vrot.slane %v6430_v8, %v6420_v6 }
  0x16   : > { %v529_v19 = vrot.slane %v449_v10, %v6417_v5  ;;  %v533_v20 = vrot.slane %v453_v11, %v6417_v5  ;;  %v537_v21 = vrot.slane %v457_v12, %v6417_v5  ;;  %v541_v22 = vrot.slane %v461_v13, %v6417_v5 }
  0x17   : > { %v545_v26 = vrot.slane %v465_v14, %v6417_v5  ;;  %v549_v27 = vrot.slane %v469_v15, %v6417_v5  ;;  %v553_v28 = vrot.slane %v473_v16, %v6417_v5  ;;  %v557_v29 = vrot.slane %v477_v17, %v6417_v5  ;;  %v6583_v14 = vld [vmem:[%s6438_s30 + $0x30] sm:$0xff] }
  0x18   : > { %v606_v30 = vcombine.low %v529_v19, %v533_v20  ;;  %v607_v31 = vcombine.low %v537_v21, %v541_v22  ;;  %v481_v34 = vrot.slane %v6459_v18, %v6417_v5  ;;  %v485_v35 = vrot.slane %v6459_v18, %v6420_v6  ;;  %v6602_v20 = vld [vmem:[%s6438_s30 + $0x38] sm:$0xff] }
  0x19   : > { %v608_v36 = vcombine.low %v545_v26, %v549_v27  ;;  %v609_v37 = vcombine.low %v553_v28, %v557_v29  ;;  %v489_v38 = vrot.slane %v6468_v23, %v6417_v5  ;;  %v493_v39 = vrot.slane %v6468_v23, %v6420_v6 }
  0x1a   : > { %v6500_v41 = vmul.f32 %v606_v30, %v6471_v24  ;;  %v6503_v42 = vmul.f32 %v607_v31, %v6474_v25  ;;  %v561_v43 = vrot.slane %v481_v34, %v6417_v5  ;;  %v565_v44 = vrot.slane %v485_v35, %v6417_v5 }
  0x1b   : > { %v6508_v45 = vmul.f32 %v608_v36, %v6481_v32  ;;  %v6511_v46 = vmul.f32 %v609_v37, %v6484_v33  ;;  %v569_v48 = vrot.slane %v489_v38, %v6417_v5  ;;  %v573_v49 = vrot.slane %v493_v39, %v6417_v5 }
  0x1c   : > { %v6525_v51 = vcombine.high %v6500_v41, %v6500_v41  ;;  %v6529_v52 = vcombine.high %v6503_v42, %v6503_v42  ;;  %v610_v53 = vcombine.low %v561_v43, %v565_v44  ;;  %v497_v55 = vrot.slane %v6497_v40, %v6417_v5 }
  0x1d   : > { %v6543_v57 = vcombine.high %v6508_v45, %v6508_v45  ;;  %v6547_v58 = vcombine.high %v6511_v46, %v6511_v46  ;;  %v611_v59 = vcombine.low %v569_v48, %v573_v49  ;;  %v501_v60 = vrot.slane %v6497_v40, %v6420_v6 }
  0x1e   : > { %6005 = vmatprep.subr.msk.mxu0 %vm1021_vm0, %v6525_v51  ;;  %6008 = vmatprep.subr.msk.mxu1 %vm1021_vm0, %v6529_v52  ;;  %v6556_v61 = vmul.f32 %v610_v53, %v6514_v47  ;;  %v577_v62 = vrot.slane %v497_v55, %v6417_v5  ;;  %v505_v63 = vrot.slane %v6521_v50, %v6417_v5 }
  0x1f   : > { %6006 = vmatpush1.msk.msra.mxu0 %vm1021_vm0, %v6500_v41  ;;  %6009 = vmatpush1.msk.msra.mxu1 %vm1021_vm0, %v6503_v42  ;;  %v6569_v10 = vmul.f32 %v611_v59, %v6532_v54  ;;  %v581_v11 = vrot.slane %v501_v60, %v6417_v5  ;;  %v509_v12 = vrot.slane %v6521_v50, %v6420_v6 }
  0x20   : > { %6007 = vmatmul.mubr.msk.f32.vlgmr.msra.gmra.mrb[0].mxu0 %vm1017_vm1, %v6539_v56  ;;  %6010 = vmatmul.mubr.msk.f32.vlgmr.msra.gmra.mrb[0].mxu1 %vm1017_vm1, %v6539_v56  ;;  %v6580_v13 = vcombine.high %v6556_v61, %v6556_v61  ;;  %v585_v15 = vrot.slane %v505_v63, %v6417_v5  ;;  %v265_v16 = vrot.slane %v6408_v3, %v6433_v9 }
  0x21   : > { %6011 = vmatprep.subr.msk.mxu0 %vm1021_vm0, %v6543_v57  ;;  %6014 = vmatprep.subr.msk.mxu1 %vm1021_vm0, %v6547_v58  ;;  %v6594_v6 = vcombine.high %v6569_v10, %v6569_v10  ;;  %v612_v17 = vcombine.low %v577_v62, %v581_v11  ;;  %v589_v19 = vrot.slane %v509_v12, %v6417_v5 }
  0x22   : > { %6012 = vmatpush1.msk.msra.mxu0 %vm1021_vm0, %v6508_v45  ;;  %6015 = vmatpush1.msk.msra.mxu1 %vm1021_vm0, %v6511_v46  ;;  %v269_v21 = vrot.slane %v6408_v3, %v6562_v0  ;;  %v345_v22 = vrot.slane %v265_v16, %v6433_v9  ;;  %v273_v26 = vrot.slane %v6413_v4, %v6433_v9 }
  0x23   : > { %1260 = vmatprep.mubr.f32.mxu0 %v7451_v1  ;;  %1331 = vmatprep.mubr.f32.mxu1 %v7451_v1  ;;  %v6612_v5 = vmul.f32 %v612_v17, %v6583_v14  ;;  %v613_v27 = vcombine.low %v585_v15, %v589_v19  ;;  %v277_v28 = vrot.slane %v6413_v4, %v6562_v0 }
  0x24   : > { %6013 = vmatmul.mubr.msk.f32.vlgmr.msra.gmra.mrb[2].mxu0 %vm1017_vm1, %v6539_v56  ;;  %6016 = vmatmul.mubr.msk.f32.vlgmr.msra.gmra.mrb[2].mxu1 %vm1017_vm1, %v6539_v56  ;;  %v349_v29 = vrot.slane %v269_v21, %v6433_v9  ;;  %v353_v30 = vrot.slane %v273_v26, %v6433_v9  ;;  %v281_v31 = vrot.slane %v6425_v7, %v6433_v9  ;;  %v6705_v26 = vld [vmem:[%s7446_s1] sm:$0xff] }
  0x25   : > { %6017 = vmatprep.subr.msk.mxu0 %vm1021_vm0, %v6580_v13  ;;  %6020 = vmatprep.subr.msk.mxu1 %vm1021_vm0, %v6594_v6  ;;  %v6630_v34 = vcombine.high %v6612_v5, %v6612_v5  ;;  %v6633_v35 = vmul.f32 %v613_v27, %v6602_v20  ;;  %v357_v36 = vrot.slane %v277_v28, %v6433_v9 }
  0x26   : > { %6018 = vmatpush1.msk.msra.mxu0 %vm1021_vm0, %v6556_v61  ;;  %6021 = vmatpush1.msk.msra.mxu1 %vm1021_vm0, %v6569_v10  ;;  %v422_v37 = vcombine.low %v345_v22, %v349_v29  ;;  %v285_v38 = vrot.slane %v6425_v7, %v6562_v0  ;;  %v361_v39 = vrot.slane %v281_v31, %v6433_v9  ;;  %v6713_v29 = vsub.s32 2, %v6403_v2 }
  0x27   : > { %1402 = vmatprep.mubr.f32.mxu0 %v7451_v1  ;;  %1473 = vmatprep.mubr.f32.mxu1 %v7451_v1  ;;  %v6647_v43 = vcombine.high %v6633_v35, %v6633_v35  ;;  %v423_v44 = vcombine.low %v353_v30, %v357_v36  ;;  %v289_v48 = vrot.slane %v6430_v8, %v6433_v9 }
  0x28   : > { %6019 = vmatmul.mubr.msk.f32.vlgmr.msra.gmra.mrb[4].mxu0 %vm1017_vm1, %v6539_v56  ;;  %6022 = vmatmul.mubr.msk.f32.vlgmr.msra.gmra.mrb[4].mxu1 %vm1017_vm1, %v6539_v56  ;;  %v6656_v49 = vmul.f32 %v422_v37, %v6471_v24  ;;  %v365_v53 = vrot.slane %v285_v38, %v6433_v9  ;;  %v293_v55 = vrot.slane %v6430_v8, %v6562_v0 }
  0x29   : > { %6023 = vmatprep.subr.msk.mxu0 %vm1021_vm0, %v6630_v34  ;;  %6026 = vmatprep.subr.msk.mxu1 %vm1021_vm0, %v6647_v43  ;;  %v6666_v59 = vmul.f32 %v423_v44, %v6474_v25  ;;  %v369_v60 = vrot.slane %v289_v48, %v6433_v9  ;;  %v297_v62 = vrot.slane %v6459_v18, %v6433_v9 }
  0x2a   : > { %6024 = vmatpush1.msk.msra.mxu0 %vm1021_vm0, %v6612_v5  ;;  %6027 = vmatpush1.msk.msra.mxu1 %vm1021_vm0, %v6633_v35  ;;  %v6677_v63 = vcombine.high %v6656_v49, %v6656_v49  ;;  %v424_v11 = vcombine.low %v361_v39, %v365_v53  ;;  %v373_v12 = vrot.slane %v293_v55, %v6433_v9  ;;  %v6744_v55 = vsub.s32 6, %v6403_v2 }
  0x2b   : > { %1544 = vmatprep.mubr.f32.mxu0 %v7451_v1  ;;  %1615 = vmatprep.mubr.f32.mxu1 %v7451_v1  ;;  %v6684_v15 = vcombine.high %v6666_v59, %v6666_v59  ;;  %v301_v16 = vrot.slane %v6459_v18, %v6562_v0  ;;  %v377_v17 = vrot.slane %v297_v62, %v6433_v9 }
  0x2c   : > { %6025 = vmatmul.mubr.msk.f32.vlgmr.msra.gmra.mrb[6].mxu0 %vm1017_vm1, %v6539_v56  ;;  %6028 = vmatmul.mubr.msk.f32.vlgmr.msra.gmra.mrb[6].mxu1 %vm1017_vm1, %v6539_v56  ;;  %v6694_v19 = vmul.f32 %v424_v11, %v6481_v32  ;;  %v425_v21 = vcombine.low %v369_v60, %v373_v12  ;;  %v305_v22 = vrot.slane %v6468_v23, %v6433_v9 }
  0x2d   : > { %6029 = vmatprep.subr.msk.mxu0 %vm1021_vm0, %v6677_v63  ;;  %6032 = vmatprep.subr.msk.mxu1 %vm1021_vm0, %v6684_v15  ;;  %v381_v56 = vrot.slane %v301_v16, %v6433_v9  ;;  %v309_v27 = vrot.slane %v6468_v23, %v6562_v0  ;;  %v313_v28 = vrot.slane %v6497_v40, %v6433_v9 }
  0x2e   : > { %6030 = vmatpush1.msk.msra.mxu0 %vm1021_vm0, %v6656_v49  ;;  %6033 = vmatpush1.msk.msra.mxu1 %vm1021_vm0, %v6666_v59  ;;  %v6721_v30 = vcombine.high %v6694_v19, %v6694_v19  ;;  %v6724_v31 = vmul.f32 %v425_v21, %v6484_v33  ;;  %v385_v36 = vrot.slane %v305_v22, %v6433_v9 }
  0x2f   : > { %1737 = vmatprep.mubr.f32.mxu0 %v7451_v1  ;;  %1808 = vmatprep.mubr.f32.mxu1 %v7451_v1  ;;  %v426_v37 = vcombine.low %v377_v17, %v381_v56  ;;  %v389_v38 = vrot.slane %v309_v27, %v6433_v9  ;;  %v317_v39 = vrot.slane %v6497_v40, %v6562_v0 }
  0x30   : > { %6031 = vmatmul.mubr.msk.f32.vlgmr.msra.gmra.mrb[0].mxu0 %vm1017_vm1, %v6705_v26  ;;  %6034 = vmatmul.mubr.msk.f32.vlgmr.msra.gmra.mrb[0].mxu1 %vm1017_vm1, %v6705_v26  ;;  %v6738_v44 = vcombine.high %v6724_v31, %v6724_v31  ;;  %v393_v48 = vrot.slane %v313_v28, %v6433_v9  ;;  %v321_v53 = vrot.slane %v6521_v50, %v6433_v9 }
  0x31   : > { %6035 = vmatprep.subr.msk.mxu0 %vm1021_vm0, %v6721_v30  ;;  %1879 = vmatprep.mubr.f32.mxu0 %v7451_v1  ;;  %v6750_v60 = vmul.f32 %v426_v37, %v6514_v47  ;;  %v427_v62 = vcombine.low %v385_v36, %v389_v38  ;;  %v397_v11 = vrot.slane %v317_v39, %v6433_v9 }
  0x32   : > { %6038 = vmatprep.subr.msk.mxu1 %vm1021_vm0, %v6738_v44  ;;  %6036 = vmatpush1.msk.msra.mxu0 %vm1021_vm0, %v6694_v19  ;;  %v325_v12 = vrot.slane %v6521_v50, %v6562_v0  ;;  %v401_v16 = vrot.slane %v321_v53, %v6433_v9  ;;  %v633_v17 = vrot.slane %v6408_v3, %v6713_v29 }
  0x33   : > { %6039 = vmatpush1.msk.msra.mxu1 %vm1021_vm0, %v6724_v31  ;;  %1950 = vmatprep.mubr.f32.mxu1 %v7451_v1  ;;  %v6767_v21 = vcombine.high %v6750_v60, %v6750_v60  ;;  %v6770_v22 = vmul.f32 %v427_v62, %v6532_v54  ;;  %v428_v56 = vcombine.low %v393_v48, %v397_v11 }
  0x34   : > { %6037 = vmatmul.mubr.msk.f32.vlgmr.msra.gmra.mrb[2].mxu0 %vm1017_vm1, %v6705_v26  ;;  %6040 = vmatmul.mubr.msk.f32.vlgmr.msra.gmra.mrb[2].mxu1 %vm1017_vm1, %v6705_v26  ;;  %v405_v0 = vrot.slane %v325_v12, %v6433_v9  ;;  %v637_v27 = vrot.slane %v6408_v3, %v6744_v55  ;;  %v713_v28 = vrot.slane %v633_v17, %v6713_v29 }
  0x35   : > { %6041 = vmatprep.subr.msk.mxu0 %vm1021_vm0, %v6767_v21  ;;  %v6784_v36 = vcombine.high %v6770_v22, %v6770_v22  ;;  %2021 = vmatprep.mubr.f32.mxu0 %v7451_v1  ;;  %v6788_v37 = vmul.f32 %v428_v56, %v6583_v14  ;;  %v641_v9 = vrot.slane %v6413_v4, %v6713_v29 }
  0x36   : > { %6042 = vmatpush1.msk.msra.mxu0 %vm1021_vm0, %v6750_v60  ;;  %2092 = vmatprep.mubr.f32.mxu1 %v7451_v1  ;;  %v429_v38 = vcombine.low %v401_v16, %v405_v0  ;;  %v717_v39 = vrot.slane %v637_v27, %v6713_v29  ;;  %v645_v48 = vrot.slane %v6413_v4, %v6744_v55 }
  0x37   : > { %7465 = vst [vmem:[#allocation2_spill] sm:$0xff] %v6788_v37  ;;  %6044 = vmatprep.subr.msk.mxu1 %vm1021_vm0, %v6784_v36  ;;  %v6802_v53 = vcombine.high %v6788_v37, %v6788_v37  ;;  %v721_v62 = vrot.slane %v641_v9, %v6713_v29  ;;  %v649_v11 = vrot.slane %v6425_v7, %v6713_v29 }
  0x38   : > { %v653_v12 = vrot.slane %v6425_v7, %v6744_v55  ;;  %6045 = vmatpush1.msk.msra.mxu1 %vm1021_vm0, %v6770_v22  ;;  %6043 = vmatmul.mubr.msk.f32.vlgmr.msra.gmra.mrb[4].mxu0 %vm1017_vm1, %v6705_v26  ;;  %v6814_v16 = vmul.f32 %v429_v38, %v6602_v20  ;;  %v790_v17 = vcombine.low %v713_v28, %v717_v39 }
  0x39   : > { %7466 = vst [vmem:[#allocation3_spill] sm:$0xff] %v6802_v53  ;;  %v725_v56 = vrot.slane %v645_v48, %v6713_v29  ;;  %6046 = vmatmul.mubr.msk.f32.vlgmr.msra.gmra.mrb[4].mxu1 %vm1017_vm1, %v6705_v26  ;;  %6047 = vmatprep.subr.msk.mxu0 %vm1021_vm0, %v6802_v53  ;;  %v729_v0 = vrot.slane %v649_v11, %v6713_v29 }
  0x3a   : > { %7467 = vst [vmem:[#allocation4_spill] sm:$0xff] %v6814_v16  ;;  %v733_v27 = vrot.slane %v653_v12, %v6713_v29  ;;  %v657_v9 = vrot.slane %v6430_v8, %v6713_v29  ;;  %v6827_v38 = vcombine.high %v6814_v16, %v6814_v16  ;;  %6048 = vmatpush1.msk.msra.mxu0 %vm1021_vm0, %v6788_v37  ;;  %v6888_v37 = vsub.s32 3, %v6403_v2 }
  0x3b   : > { %2163 = vmatprep.mubr.f32.mxu0 %v7451_v1  ;;  %v6833_v28 = vmul.f32 %v790_v17, %v6471_v24  ;;  %v791_v39 = vcombine.low %v721_v62, %v725_v56  ;;  %2234 = vmatprep.mubr.f32.mxu1 %v7451_v1  ;;  %v661_v11 = vrot.slane %v6430_v8, %v6744_v55 }
  0x3c   : > { %7468 = vst [vmem:[#allocation5_spill] sm:$0xff] %v6827_v38  ;;  %v792_v48 = vcombine.low %v729_v0, %v733_v27  ;;  %v737_v12 = vrot.slane %v657_v9, %v6713_v29  ;;  %v665_v53 = vrot.slane %v6459_v18, %v6713_v29  ;;  %6050 = vmatprep.subr.msk.mxu1 %vm1021_vm0, %v6827_v38  ;;  %v6860_v0 = vld [vmem:[%s7446_s1 + $0x10] sm:$0xff] }
  0x3d   : > { %7469 = vst [vmem:[#allocation6_spill] sm:$0xff] %v6833_v28  ;;  %6049 = vmatmul.mubr.msk.f32.vlgmr.msra.gmra.mrb[6].mxu0 %vm1017_vm1, %v6705_v26  ;;  %v6847_v62 = vcombine.high %v6833_v28, %v6833_v28  ;;  %v6850_v17 = vmul.f32 %v791_v39, %v6474_v25  ;;  %v669_v56 = vrot.slane %v6459_v18, %v6744_v55 }
  0x3e   : > { %6051 = vmatpush1.msk.msra.mxu1 %vm1021_vm0, %v6814_v16  ;;  %2358 = vmatprep.mubr.f32.mxu0 %v7451_v1  ;;  %v6863_v27 = vmul.f32 %v792_v48, %v6481_v32  ;;  %v741_v9 = vrot.slane %v661_v11, %v6713_v29  ;;  %v745_v39 = vrot.slane %v665_v53, %v6713_v29  ;;  %v7474_v11 = vmov 0.0  }
  0x3f   : > { %7470 = vst [vmem:[#allocation7_spill] sm:$0xff] %v6847_v62  ;;  %7471 = vst [vmem:[#allocation8_spill] sm:$0xff] %v6850_v17  ;;  %6052 = vmatmul.mubr.msk.f32.vlgmr.msra.gmra.mrb[6].mxu1 %vm1017_vm1, %v6705_v26  ;;  %6054 = vmatprep.subr.msk.mxu0 %vm1021_vm0, %v6847_v62  ;;  %v6873_v1 = vcombine.high %v6850_v17, %v6850_v17  ;;  %v749_v16 = vrot.slane %v669_v56, %v6713_v29 }
  0x40   : > { %7472 = vst [vmem:[#allocation9_spill] sm:$0xff] %v6863_v27  ;;  %v673_v48 = vrot.slane %v6468_v23, %v6713_v29  ;;  %6055 = vmatpush1.msk.msra.mxu0 %vm1021_vm0, %v6833_v28  ;;  %2429 = vmatprep.mubr.f32.mxu1 %v7474_v11  ;;  %v6883_v26 = vcombine.high %v6863_v27, %v6863_v27 }
  0x41   : > { %7473 = vst [vmem:[#allocation10_spill] sm:$0xff] %v6873_v1  ;;  %v793_v53 = vcombine.low %v737_v12, %v741_v9  ;;  %v677_v62 = vrot.slane %v6468_v23, %v6744_v55  ;;  %6057 = vmatprep.subr.msk.mxu1 %vm1021_vm0, %v6873_v1  ;;  %6056 = vmatmul.mubr.msk.f32.vlgmr.msra.gmra.mrb[0].mxu0 %vm1017_vm1, %v6860_v0 }
  0x42   : > { %7475 = vst [vmem:[#allocation11_spill] sm:$0xff] %v6883_v26  ;;  %v794_v56 = vcombine.low %v745_v39, %v749_v16  ;;  %v753_v28 = vrot.slane %v673_v48, %v6713_v29  ;;  %v681_v38 = vrot.slane %v6497_v40, %v6713_v29  ;;  %6058 = vmatpush1.msk.msra.mxu1 %vm1021_vm0, %v6850_v17  ;;  %v6908_v16 = vsub.s32 7, %v6403_v2 }
  0x43   : > { %6060 = vmatprep.subr.msk.mxu0 %vm1021_vm0, %v6883_v26  ;;  %v6902_v12 = vmul.f32 %v793_v53, %v6484_v33  ;;  %v757_v9 = vrot.slane %v677_v62, %v6713_v29  ;;  %v685_v1 = vrot.slane %v6497_v40, %v6744_v55  ;;  %6059 = vmatmul.mubr.msk.f32.vlgmr.msra.gmra.mrb[0].mxu1 %vm1017_vm1, %v6860_v0 }
  0x44   : > { %6061 = vmatpush1.msk.msra.mxu0 %vm1021_vm0, %v6863_v27  ;;  %v6915_v39 = vmul.f32 %v794_v56, %v6514_v47  ;;  %v761_v48 = vrot.slane %v681_v38, %v6713_v29  ;;  %v689_v62 = vrot.slane %v6521_v50, %v6713_v29  ;;  %2500 = vmatprep.mubr.f32.mxu0 %v7474_v11 }
  0x45   : > { %v6922_v53 = vcombine.high %v6902_v12, %v6902_v12  ;;  %2571 = vmatprep.mubr.f32.mxu1 %v7474_v11  ;;  %v795_v2 = vcombine.low %v753_v28, %v757_v9  ;;  %v765_v26 = vrot.slane %v685_v1, %v6713_v29  ;;  %6062 = vmatmul.mubr.msk.f32.vlgmr.msra.gmra.mrb[2].mxu0 %vm1017_vm1, %v6860_v0 }
  0x46   : > { %7476 = vst [vmem:[#allocation12_spill] sm:$0xff] %v6915_v39  ;;  %v6931_v38 = vcombine.high %v6915_v39, %v6915_v39  ;;  %v693_v56 = vrot.slane %v6521_v50, %v6744_v55  ;;  %v769_v27 = vrot.slane %v689_v62, %v6713_v29  ;;  %v817_v17 = vrot.slane %v6408_v3, %v6888_v37 }
  0x47   : > { %6063 = vmatprep.subr.msk.mxu1 %vm1021_vm0, %v6922_v53  ;;  %v6941_v1 = vmul.f32 %v795_v2, %v6532_v54  ;;  %2642 = vmatprep.mubr.f32.mxu0 %v7474_v11  ;;  %v796_v28 = vcombine.low %v761_v48, %v765_v26  ;;  %v821_v9 = vrot.slane %v6408_v3, %v6908_v16 }
  0x48   : > { %6064 = vmatpush1.msk.msra.mxu1 %vm1021_vm0, %v6902_v12  ;;  %6066 = vmatprep.subr.msk.mxu0 %vm1021_vm0, %v6931_v38  ;;  %v773_v55 = vrot.slane %v693_v56, %v6713_v29  ;;  %v897_v62 = vrot.slane %v817_v17, %v6888_v37  ;;  %v825_v2 = vrot.slane %v6413_v4, %v6888_v37 }
  0x49   : > { %6065 = vmatmul.mubr.msk.f32.vlgmr.msra.gmra.mrb[2].mxu1 %vm1017_vm1, %v6860_v0  ;;  %v6958_v26 = vcombine.high %v6941_v1, %v6941_v1  ;;  %6067 = vmatpush1.msk.msra.mxu0 %vm1021_vm0, %v6915_v39  ;;  %v6963_v3 = vmul.f32 %v796_v28, %v6583_v14  ;;  %v901_v29 = vrot.slane %v821_v9, %v6888_v37 }
  0x4a   : > { %2713 = vmatprep.mubr.f32.mxu1 %v7474_v11  ;;  %6068 = vmatmul.mubr.msk.f32.vlgmr.msra.gmra.mrb[4].mxu0 %vm1017_vm1, %v6860_v0  ;;  %v797_v17 = vcombine.low %v769_v27, %v773_v55  ;;  %v829_v48 = vrot.slane %v6413_v4, %v6908_v16  ;;  %v905_v56 = vrot.slane %v825_v2, %v6888_v37 }
  0x4b   : > { %6069 = vmatprep.subr.msk.mxu1 %vm1021_vm0, %v6958_v26  ;;  %v6976_v28 = vcombine.high %v6963_v3, %v6963_v3  ;;  %2784 = vmatprep.mubr.f32.mxu0 %v7474_v11  ;;  %v974_v9 = vcombine.low %v897_v62, %v901_v29  ;;  %v833_v39 = vrot.slane %v6425_v7, %v6888_v37 }
  0x4c   : > { %6070 = vmatpush1.msk.msra.mxu1 %vm1021_vm0, %v6941_v1  ;;  %v6984_v4 = vmul.f32 %v797_v17, %v6602_v20  ;;  %v909_v27 = vrot.slane %v829_v48, %v6888_v37  ;;  %v837_v55 = vrot.slane %v6425_v7, %v6908_v16  ;;  %v841_v2 = vrot.slane %v6430_v8, %v6888_v37 }
  0x4d   : > { %7477 = vst [vmem:[#allocation13_spill] sm:$0xff] %v6976_v28  ;;  %6071 = vmatmul.mubr.msk.f32.vlgmr.msra.gmra.mrb[4].mxu1 %vm1017_vm1, %v6860_v0  ;;  %6072 = vmatprep.subr.msk.mxu0 %vm1021_vm0, %v6976_v28  ;;  %v6996_v62 = vmul.f32 %v974_v9, %v6471_v24  ;;  %v913_v29 = vrot.slane %v833_v39, %v6888_v37 }
  0x4e   : > { %v845_v17 = vrot.slane %v6430_v8, %v6908_v16  ;;  %v7003_v7 = vcombine.high %v6984_v4, %v6984_v4  ;;  %6073 = vmatpush1.msk.msra.mxu0 %vm1021_vm0, %v6963_v3  ;;  %2855 = vmatprep.mubr.f32.mxu1 %v7474_v11  ;;  %v975_v48 = vcombine.low %v905_v56, %v909_v27  ;;  %v7028_v27 = vld [vmem:[%s7446_s1 + $0x18] sm:$0xff] }
  0x4f   : > { %v917_v28 = vrot.slane %v837_v55, %v6888_v37  ;;  %6074 = vmatmul.mubr.msk.f32.vlgmr.msra.gmra.mrb[6].mxu0 %vm1017_vm1, %v6860_v0  ;;  %v7013_v24 = vcombine.high %v6996_v62, %v6996_v62  ;;  %v921_v8 = vrot.slane %v841_v2, %v6888_v37  ;;  %v849_v9 = vrot.slane %v6459_v18, %v6888_v37 }
  0x50   : > { %v925_v39 = vrot.slane %v845_v17, %v6888_v37  ;;  %6075 = vmatprep.subr.msk.mxu1 %vm1021_vm0, %v7003_v7  ;;  %v7022_v56 = vmul.f32 %v975_v48, %v6474_v25  ;;  %2995 = vmatprep.mubr.f32.mxu0 %v7474_v11  ;;  %v853_v2 = vrot.slane %v6459_v18, %v6908_v16 }
  0x51   : > { %v976_v55 = vcombine.low %v913_v29, %v917_v28  ;;  %6076 = vmatpush1.msk.msra.mxu1 %vm1021_vm0, %v6984_v4  ;;  %6079 = vmatprep.subr.msk.mxu0 %vm1021_vm0, %v7013_v24  ;;  %v929_v25 = vrot.slane %v849_v9, %v6888_v37  ;;  %v857_v48 = vrot.slane %v6468_v23, %v6888_v37 }
  0x52   : > { %7478 = vst [vmem:[#allocation14_spill] sm:$0xff] %v7022_v56  ;;  %v977_v17 = vcombine.low %v921_v8, %v925_v39  ;;  %6077 = vmatmul.mubr.msk.f32.vlgmr.msra.gmra.mrb[6].mxu1 %vm1017_vm1, %v6860_v0  ;;  %v7043_v28 = vcombine.high %v7022_v56, %v7022_v56  ;;  %6080 = vmatpush1.msk.msra.mxu0 %vm1021_vm0, %v6996_v62 }
  0x53   : > { %v7048_v18 = vmul.f32 %v976_v55, %v6481_v32  ;;  %v933_v29 = vrot.slane %v853_v2, %v6888_v37  ;;  %3066 = vmatprep.mubr.f32.mxu1 %v7474_v11  ;;  %6081 = vmatmul.mubr.msk.f32.vlgmr.msra.gmra.mrb[0].mxu0 %vm1017_vm1, %v7028_v27  ;;  %v861_v0 = vrot.slane %v6468_v23, %v6908_v16 }
  0x54   : > { %v7055_v8 = vmul.f32 %v977_v17, %v6484_v33  ;;  %v937_v39 = vrot.slane %v857_v48, %v6888_v37  ;;  %6082 = vmatprep.subr.msk.mxu1 %vm1021_vm0, %v7043_v28  ;;  %3137 = vmatprep.mubr.f32.mxu0 %v7474_v11  ;;  %v865_v55 = vrot.slane %v6497_v40, %v6888_v37 }
  0x55   : > { %v7064_v32 = vcombine.high %v7048_v18, %v7048_v18  ;;  %v978_v9 = vcombine.low %v929_v25, %v933_v29  ;;  %6083 = vmatpush1.msk.msra.mxu1 %vm1021_vm0, %v7022_v56  ;;  %v941_v33 = vrot.slane %v861_v0, %v6888_v37  ;;  %v869_v2 = vrot.slane %v6497_v40, %v6908_v16 }
  0x56   : > { %v7073_v23 = vcombine.high %v7055_v8, %v7055_v8  ;;  %v873_v17 = vrot.slane %v6521_v50, %v6888_v37  ;;  %6084 = vmatmul.mubr.msk.f32.vlgmr.msra.gmra.mrb[0].mxu1 %vm1017_vm1, %v7028_v27  ;;  %v945_v48 = vrot.slane %v865_v55, %v6888_v37  ;;  %v877_v29 = vrot.slane %v6521_v50, %v6908_v16  ;;  %v253_v55 = vld [vmem:[%s7448_s3] sm:$0xff] }
  0x57   : > { %6085 = vmatprep.subr.msk.mxu0 %vm1021_vm0, %v7064_v32  ;;  %v7085_v25 = vmul.f32 %v978_v9, %v6514_v47  ;;  %v979_v40 = vcombine.low %v937_v39, %v941_v33  ;;  %v949_v0 = vrot.slane %v869_v2, %v6888_v37  ;;  %3208 = vmatprep.mubr.f32.mxu1 %v7474_v11  ;;  %v6355_v9 = vmov 0  }
  0x58   : > { %6088 = vmatprep.subr.msk.mxu1 %vm1021_vm0, %v7073_v23  ;;  %6086 = vmatpush1.msk.msra.mxu0 %vm1021_vm0, %v7048_v18  ;;  %v953_v56 = vrot.slane %v873_v17, %v6888_v37  ;;  %v957_v50 = vrot.slane %v877_v29, %v6888_v37 }
  0x59   : > { %6089 = vmatpush1.msk.msra.mxu1 %vm1021_vm0, %v7055_v8  ;;  %v7101_v47 = vcombine.high %v7085_v25, %v7085_v25  ;;  %6087 = vmatmul.mubr.msk.f32.vlgmr.msra.gmra.mrb[2].mxu0 %vm1017_vm1, %v7028_v27  ;;  %v7107_v16 = vmul.f32 %v979_v40, %v6532_v54  ;;  %v980_v39 = vcombine.low %v945_v48, %v949_v0 }
  0x5a   : > { %6329 = vset.pattern.permute.xlu0 %v6355_v9  ;;  %6090 = vmatmul.mubr.msk.f32.vlgmr.msra.gmra.mrb[2].mxu1 %vm1017_vm1, %v7028_v27  ;;  %v981_v37 = vcombine.low %v953_v56, %v957_v50 }
  0x5b   : > { %6091 = vmatprep.subr.msk.mxu0 %vm1021_vm0, %v7101_v47  ;;  %v7118_v33 = vcombine.high %v7107_v16, %v7107_v16  ;;  %3279 = vmatprep.mubr.f32.mxu0 %v7474_v11  ;;  %v7124_v54 = vmul.f32 %v980_v39, %v6583_v14 }
  0x5c   : > { %6092 = vmatpush1.msk.msra.mxu0 %vm1021_vm0, %v7085_v25  ;;  %3350 = vmatprep.mubr.f32.mxu1 %v7474_v11  ;;  %v7128_v2 = vmul.f32 %v981_v37, %v6602_v20  ;;  %v6104_v20 = vld [vmem:[%s7446_s1 + $0x28] sm:$0xff] }
  0x5d   : > { %3517 = vperm.xlu0 %6329, %v253_v55   ;;  %6094 = vmatprep.subr.msk.mxu1 %vm1021_vm0, %v7118_v33  ;;  %v7136_v56 = vcombine.high %v7124_v54, %v7124_v54 }
  0x5e   : > { %6093 = vmatmul.mubr.msk.f32.vlgmr.msra.gmra.mrb[4].mxu0 %vm1017_vm1, %v7028_v27  ;;  %6095 = vmatpush1.msk.msra.mxu1 %vm1021_vm0, %v7107_v16  ;;  %v7142_v14 = vcombine.high %v7128_v2, %v7128_v2 }
  0x5f   : > { %3421 = vmatprep.mubr.f32.mxu0 %v7474_v11  ;;  %6096 = vmatmul.mubr.msk.f32.vlgmr.msra.gmra.mrb[4].mxu1 %vm1017_vm1, %v7028_v27 }
  0x60   : > { %6097 = vmatprep.subr.msk.mxu0 %vm1021_vm0, %v7136_v56  ;;  %6100 = vmatprep.subr.msk.mxu1 %vm1021_vm0, %v7142_v14 }
  0x61   : > { %6098 = vmatpush1.msk.msra.mxu0 %vm1021_vm0, %v7124_v54  ;;  %6101 = vmatpush1.msk.msra.mxu1 %vm1021_vm0, %v7128_v2 }
  0x62   : > { %3492 = vmatprep.mubr.f32.mxu1 %v7474_v11  ;;  %6099 = vmatmul.mubr.msk.f32.vlgmr.msra.gmra.mrb[6].mxu0 %vm1017_vm1, %v7028_v27 }
  0x63   : > { %6105 = vmatprep.subr.msk.mxu0 %vm1021_vm0, %v6525_v51  ;;  %6102 = vmatmul.mubr.msk.f32.vlgmr.msra.gmra.mrb[6].mxu1 %vm1017_vm1, %v7028_v27  ;;  %v7482_v51 = vld [vmem:[#allocation4_spill] sm:$0xff] }
  0x64   : > { %6108 = vmatprep.subr.msk.mxu1 %vm1021_vm0, %v6529_v52  ;;  %6106 = vmatpush1.msk.msra.mxu0 %vm1021_vm0, %v6500_v41  ;;  %v6103_v41 = vld [vmem:[%s7446_s1 + $0x20] sm:$0xff]  ;;  %v7483_v52 = vld [vmem:[#allocation7_spill] sm:$0xff] }
  0x65   : > { %6109 = vmatpush1.msk.msra.mxu1 %vm1021_vm0, %v6503_v42  ;;  %3623 = vmatprep.mubr.f32.mxu0 %v7474_v11  ;;  %v7479_v42 = vld [vmem:[#allocation3_spill] sm:$0xff] }
  0x66   : > { %3694 = vmatprep.mubr.f32.mxu1 %v7474_v11  ;;  %6107 = vmatmul.mubr.msk.f32.vlgmr.msra.gmra.mrb[8].mxu0 %vm1017_vm1, %v6104_v20 }
  0x67   : > { %6111 = vmatprep.subr.msk.mxu0 %vm1021_vm0, %v6543_v57  ;;  %6110 = vmatmul.mubr.msk.f32.vlgmr.msra.gmra.mrb[8].mxu1 %vm1017_vm1, %v6104_v20  ;;  %v7484_v57 = vld [vmem:[#allocation10_spill] sm:$0xff] }
  0x68   : > { %6114 = vmatprep.subr.msk.mxu1 %vm1021_vm0, %v6547_v58  ;;  %6112 = vmatpush1.msk.msra.mxu0 %vm1021_vm0, %v6508_v45  ;;  %v7480_v45 = vld [vmem:[#allocation5_spill] sm:$0xff]  ;;  %v6153_v58 = vld [vmem:[%s7446_s1 + $0x30] sm:$0xff] }
  0x69   : > { %6115 = vmatpush1.msk.msra.mxu1 %vm1021_vm0, %v6511_v46  ;;  %3765 = vmatprep.mubr.f32.mxu0 %v7474_v11  ;;  %v7481_v46 = vld [vmem:[#allocation2_spill] sm:$0xff] }
  0x6a   : > { %3836 = vmatprep.mubr.f32.mxu1 %v7474_v11  ;;  %6113 = vmatmul.mubr.msk.f32.vlgmr.msra.gmra.mrb[10].mxu0 %vm1017_vm1, %v6104_v20 }
  0x6b   : > { %6117 = vmatprep.subr.msk.mxu0 %vm1021_vm0, %v6580_v13  ;;  %6116 = vmatmul.mubr.msk.f32.vlgmr.msra.gmra.mrb[10].mxu1 %vm1017_vm1, %v6104_v20  ;;  %v7487_v13 = vld [vmem:[#allocation11_spill] sm:$0xff] }
  0x6c   : > { %6120 = vmatprep.subr.msk.mxu1 %vm1021_vm0, %v6594_v6  ;;  %6118 = vmatpush1.msk.msra.mxu0 %vm1021_vm0, %v6556_v61  ;;  %v7485_v61 = vld [vmem:[#allocation6_spill] sm:$0xff]  ;;  %v7488_v6 = vld [vmem:[#allocation9_spill] sm:$0xff] }
  0x6d   : > { %6121 = vmatpush1.msk.msra.mxu1 %vm1021_vm0, %v6569_v10  ;;  %3907 = vmatprep.mubr.f32.mxu0 %v7474_v11  ;;  %v7486_v10 = vld [vmem:[#allocation8_spill] sm:$0xff] }
  0x6e   : > { %3978 = vmatprep.mubr.f32.mxu1 %v7474_v11  ;;  %6119 = vmatmul.mubr.msk.f32.vlgmr.msra.gmra.mrb[12].mxu0 %vm1017_vm1, %v6104_v20 }
  0x6f   : > { %6123 = vmatprep.subr.msk.mxu0 %vm1021_vm0, %v6630_v34  ;;  %6122 = vmatmul.mubr.msk.f32.vlgmr.msra.gmra.mrb[12].mxu1 %vm1017_vm1, %v6104_v20  ;;  %v7490_v34 = vld [vmem:[#allocation13_spill] sm:$0xff] }
  0x70   : > { %6126 = vmatprep.subr.msk.mxu1 %vm1021_vm0, %v6647_v43  ;;  %6124 = vmatpush1.msk.msra.mxu0 %vm1021_vm0, %v6612_v5  ;;  %v7489_v5 = vld [vmem:[#allocation12_spill] sm:$0xff]  ;;  %v7491_v43 = vld [vmem:[#allocation14_spill] sm:$0xff] }
  0x71   : > { %6127 = vmatpush1.msk.msra.mxu1 %vm1021_vm0, %v6633_v35  ;;  %4049 = vmatprep.mubr.f32.mxu0 %v7474_v11  ;;  %v6178_v35 = vld [vmem:[%s7446_s1 + $0x38] sm:$0xff] }
  0x72   : > { %4120 = vmatprep.mubr.f32.mxu1 %v7474_v11  ;;  %6125 = vmatmul.mubr.msk.f32.vlgmr.msra.gmra.mrb[14].mxu0 %vm1017_vm1, %v6104_v20 }
  0x73   : > { %6129 = vmatprep.subr.msk.mxu0 %vm1021_vm0, %v6677_v63  ;;  %6128 = vmatmul.mubr.msk.f32.vlgmr.msra.gmra.mrb[14].mxu1 %vm1017_vm1, %v6104_v20 }
  0x74   : > { %6132 = vmatprep.subr.msk.mxu1 %vm1021_vm0, %v6684_v15  ;;  %6130 = vmatpush1.msk.msra.mxu0 %vm1021_vm0, %v6656_v49 }
  0x75   : > { %6133 = vmatpush1.msk.msra.mxu1 %vm1021_vm0, %v6666_v59  ;;  %4194 = vmatprep.mubr.f32.mxu0 %v7474_v11 }
  0x76   : > { %4265 = vmatprep.mubr.f32.mxu1 %v7474_v11  ;;  %6131 = vmatmul.mubr.msk.f32.vlgmr.msra.gmra.mrb[8].mxu0 %vm1017_vm1, %v6103_v41 }
  0x77   : > { %6135 = vmatprep.subr.msk.mxu0 %vm1021_vm0, %v6721_v30  ;;  %6134 = vmatmul.mubr.msk.f32.vlgmr.msra.gmra.mrb[8].mxu1 %vm1017_vm1, %v6103_v41 }
  0x78   : > { %6138 = vmatprep.subr.msk.mxu1 %vm1021_vm0, %v6738_v44  ;;  %6136 = vmatpush1.msk.msra.mxu0 %vm1021_vm0, %v6694_v19 }
  0x79   : > { %6139 = vmatpush1.msk.msra.mxu1 %vm1021_vm0, %v6724_v31  ;;  %4336 = vmatprep.mubr.f32.mxu0 %v7474_v11 }
  0x7a   : > { %4407 = vmatprep.mubr.f32.mxu1 %v7474_v11  ;;  %6137 = vmatmul.mubr.msk.f32.vlgmr.msra.gmra.mrb[10].mxu0 %vm1017_vm1, %v6103_v41 }
  0x7b   : > { %6141 = vmatprep.subr.msk.mxu0 %vm1021_vm0, %v6767_v21  ;;  %6140 = vmatmul.mubr.msk.f32.vlgmr.msra.gmra.mrb[10].mxu1 %vm1017_vm1, %v6103_v41 }
  0x7c   : > { %6144 = vmatprep.subr.msk.mxu1 %vm1021_vm0, %v6784_v36  ;;  %6142 = vmatpush1.msk.msra.mxu0 %vm1021_vm0, %v6750_v60 }
  0x7d   : > { %6145 = vmatpush1.msk.msra.mxu1 %vm1021_vm0, %v6770_v22  ;;  %4478 = vmatprep.mubr.f32.mxu0 %v7474_v11 }
  0x7e   : > { %4549 = vmatprep.mubr.f32.mxu1 %v7474_v11  ;;  %6143 = vmatmul.mubr.msk.f32.vlgmr.msra.gmra.mrb[12].mxu0 %vm1017_vm1, %v6103_v41 }
  0x7f   : > { %6147 = vmatprep.subr.msk.mxu0 %vm1021_vm0, %v7479_v42  ;;  %6146 = vmatmul.mubr.msk.f32.vlgmr.msra.gmra.mrb[12].mxu1 %vm1017_vm1, %v6103_v41 }
  0x80   : > { %6150 = vmatprep.subr.msk.mxu1 %vm1021_vm0, %v7480_v45  ;;  %6148 = vmatpush1.msk.msra.mxu0 %vm1021_vm0, %v7481_v46 }
  0x81   : > { %6151 = vmatpush1.msk.msra.mxu1 %vm1021_vm0, %v7482_v51  ;;  %4620 = vmatprep.mubr.f32.mxu0 %v7474_v11 }
  0x82   : > { %4691 = vmatprep.mubr.f32.mxu1 %v7474_v11  ;;  %6149 = vmatmul.mubr.msk.f32.vlgmr.msra.gmra.mrb[14].mxu0 %vm1017_vm1, %v6103_v41 }
  0x83   : > { %6154 = vmatprep.subr.msk.mxu0 %vm1021_vm0, %v7483_v52  ;;  %6152 = vmatmul.mubr.msk.f32.vlgmr.msra.gmra.mrb[14].mxu1 %vm1017_vm1, %v6103_v41 }
  0x84   : > { %6157 = vmatprep.subr.msk.mxu1 %vm1021_vm0, %v7484_v57  ;;  %6155 = vmatpush1.msk.msra.mxu0 %vm1021_vm0, %v7485_v61 }
  0x85   : > { %6158 = vmatpush1.msk.msra.mxu1 %vm1021_vm0, %v7486_v10  ;;  %4767 = vmatprep.mubr.f32.mxu0 %v7474_v11 }
  0x86   : > { %4838 = vmatprep.mubr.f32.mxu1 %v7474_v11  ;;  %6156 = vmatmul.mubr.msk.f32.vlgmr.msra.gmra.mrb[8].mxu0 %vm1017_vm1, %v6153_v58 }
  0x87   : > { %6160 = vmatprep.subr.msk.mxu0 %vm1021_vm0, %v7487_v13  ;;  %6159 = vmatmul.mubr.msk.f32.vlgmr.msra.gmra.mrb[8].mxu1 %vm1017_vm1, %v6153_v58 }
  0x88   : > { %6163 = vmatprep.subr.msk.mxu1 %vm1021_vm0, %v6922_v53  ;;  %6161 = vmatpush1.msk.msra.mxu0 %vm1021_vm0, %v7488_v6 }
  0x89   : > { %6164 = vmatpush1.msk.msra.mxu1 %vm1021_vm0, %v6902_v12  ;;  %4909 = vmatprep.mubr.f32.mxu0 %v7474_v11 }
  0x8a   : > { %4980 = vmatprep.mubr.f32.mxu1 %v7474_v11  ;;  %6162 = vmatmul.mubr.msk.f32.vlgmr.msra.gmra.mrb[10].mxu0 %vm1017_vm1, %v6153_v58 }
  0x8b   : > { %6166 = vmatprep.subr.msk.mxu0 %vm1021_vm0, %v6931_v38  ;;  %6165 = vmatmul.mubr.msk.f32.vlgmr.msra.gmra.mrb[10].mxu1 %vm1017_vm1, %v6153_v58 }
  0x8c   : > { %6169 = vmatprep.subr.msk.mxu1 %vm1021_vm0, %v6958_v26  ;;  %6167 = vmatpush1.msk.msra.mxu0 %vm1021_vm0, %v7489_v5 }
  0x8d   : > { %6170 = vmatpush1.msk.msra.mxu1 %vm1021_vm0, %v6941_v1  ;;  %5051 = vmatprep.mubr.f32.mxu0 %v7474_v11 }
  0x8e   : > { %5122 = vmatprep.mubr.f32.mxu1 %v7474_v11  ;;  %6168 = vmatmul.mubr.msk.f32.vlgmr.msra.gmra.mrb[12].mxu0 %vm1017_vm1, %v6153_v58 }
  0x8f   : > { %6172 = vmatprep.subr.msk.mxu0 %vm1021_vm0, %v7490_v34  ;;  %6171 = vmatmul.mubr.msk.f32.vlgmr.msra.gmra.mrb[12].mxu1 %vm1017_vm1, %v6153_v58 }
  0x90   : > { %6175 = vmatprep.subr.msk.mxu1 %vm1021_vm0, %v7003_v7  ;;  %6173 = vmatpush1.msk.msra.mxu0 %vm1021_vm0, %v6963_v3 }
  0x91   : > { %6176 = vmatpush1.msk.msra.mxu1 %vm1021_vm0, %v6984_v4  ;;  %5193 = vmatprep.mubr.f32.mxu0 %v7474_v11 }
  0x92   : > { %5264 = vmatprep.mubr.f32.mxu1 %v7474_v11  ;;  %6174 = vmatmul.mubr.msk.f32.vlgmr.msra.gmra.mrb[14].mxu0 %vm1017_vm1, %v6153_v58 }
  0x93   : > { %6179 = vmatprep.subr.msk.mxu0 %vm1021_vm0, %v7013_v24  ;;  %6177 = vmatmul.mubr.msk.f32.vlgmr.msra.gmra.mrb[14].mxu1 %vm1017_vm1, %v6153_v58 }
  0x94   : > { %6182 = vmatprep.subr.msk.mxu1 %vm1021_vm0, %v7043_v28  ;;  %6180 = vmatpush1.msk.msra.mxu0 %vm1021_vm0, %v6996_v62 }
  0x95   : > { %6183 = vmatpush1.msk.msra.mxu1 %vm1021_vm0, %v7491_v43  ;;  %5356 = vmatprep.mubr.f32.mxu0 %v7474_v11 }
  0x96   : > { %5427 = vmatprep.mubr.f32.mxu1 %v7474_v11  ;;  %6181 = vmatmul.mubr.msk.f32.vlgmr.msra.gmra.mrb[8].mxu0 %vm1017_vm1, %v6178_v35 }
  0x97   : > { %6185 = vmatprep.subr.msk.mxu0 %vm1021_vm0, %v7064_v32  ;;  %6184 = vmatmul.mubr.msk.f32.vlgmr.msra.gmra.mrb[8].mxu1 %vm1017_vm1, %v6178_v35 }
  0x98   : > { %6188 = vmatprep.subr.msk.mxu1 %vm1021_vm0, %v7073_v23  ;;  %6186 = vmatpush1.msk.msra.mxu0 %vm1021_vm0, %v7048_v18 }
  0x99   : > { %6189 = vmatpush1.msk.msra.mxu1 %vm1021_vm0, %v7055_v8  ;;  %5498 = vmatprep.mubr.f32.mxu0 %v7474_v11 }
  0x9a   : > { %5569 = vmatprep.mubr.f32.mxu1 %v7474_v11  ;;  %6187 = vmatmul.mubr.msk.f32.vlgmr.msra.gmra.mrb[10].mxu0 %vm1017_vm1, %v6178_v35 }
  0x9b   : > { %6191 = vmatprep.subr.msk.mxu0 %vm1021_vm0, %v7101_v47  ;;  %6190 = vmatmul.mubr.msk.f32.vlgmr.msra.gmra.mrb[10].mxu1 %vm1017_vm1, %v6178_v35 }
  0x9c   : > { %6194 = vmatprep.subr.msk.mxu1 %vm1021_vm0, %v7118_v33  ;;  %6192 = vmatpush1.msk.msra.mxu0 %vm1021_vm0, %v7085_v25 }
  0x9d   : > { %6195 = vmatpush1.msk.msra.mxu1 %vm1021_vm0, %v7107_v16  ;;  %5640 = vmatprep.mubr.f32.mxu0 %v7474_v11 }
  0x9e   : > { %5711 = vmatprep.mubr.f32.mxu1 %v7474_v11  ;;  %6193 = vmatmul.mubr.msk.f32.vlgmr.msra.gmra.mrb[12].mxu0 %vm1017_vm1, %v6178_v35 }
  0x9f   : > { %6197 = vmatprep.subr.msk.mxu0 %vm1021_vm0, %v7136_v56  ;;  %6196 = vmatmul.mubr.msk.f32.vlgmr.msra.gmra.mrb[12].mxu1 %vm1017_vm1, %v6178_v35 }
  0xa0   : > { %6200 = vmatprep.subr.msk.mxu1 %vm1021_vm0, %v7142_v14  ;;  %6198 = vmatpush1.msk.msra.mxu0 %vm1021_vm0, %v7124_v54 }
  0xa1   : > { %6201 = vmatpush1.msk.msra.mxu1 %vm1021_vm0, %v7128_v2  ;;  %5782 = vmatprep.mubr.f32.mxu0 %v7474_v11 }
  0xa2   : > { %5853 = vmatprep.mubr.f32.mxu1 %v7474_v11  ;;  %6199 = vmatmul.mubr.msk.f32.vlgmr.msra.gmra.mrb[14].mxu0 %vm1017_vm1, %v6178_v35 }
  0xa3   : > { %6202 = vmatmul.mubr.msk.f32.vlgmr.msra.gmra.mrb[14].mxu1 %vm1017_vm1, %v6178_v35 }
  0xdc   : > { %v7365_v49 = vpop.permute.xlu0 %3517 }
 0x126   : > { %v2997_v59 = vpop.f32.mrb[0].mxu0 }
 0x127   : > { %v3520_v63 = vadd.f32 %v7365_v49, %v2997_v59  ;;  %v2999_v15 = vpop.f32.mrb[1].mxu0 }
 0x128   : > { %v3521_v19 = vadd.f32 %v7365_v49, %v2999_v15 }
 0x129   : > { %3536 = vst [vmem:[%s7370_s12] sm:$0xff] %v3520_v63  ;;  %v3068_v30 = vpop.f32.mrb[0].mxu1 }
 0x12a   : > { %v3522_v31 = vadd.f32 %v7365_v49, %v3068_v30  ;;  %3537 = vst [vmem:[%s7370_s12 + $0x8] sm:$0xff] %v3521_v19  ;;  %v3070_v44 = vpop.f32.mrb[1].mxu1 }
 0x12b   : > { %v3523_v60 = vadd.f32 %v7365_v49, %v3070_v44 }
 0x12c   : > { %3538 = vst [vmem:[%s7370_s12 + $0x20] sm:$0xff] %v3522_v31  ;;  %v3139_v21 = vpop.f32.mrb[2].mxu0 }
 0x12d   : > { %3539 = vst [vmem:[%s7370_s12 + $0x28] sm:$0xff] %v3523_v60  ;;  %v3524_v22 = vadd.f32 %v7365_v49, %v3139_v21  ;;  %v3210_v36 = vpop.f32.mrb[2].mxu1  ;;  %v3141_v11 = vpop.f32.mrb[3].mxu0 }
 0x12e   : > { %v3526_v12 = vadd.f32 %v7365_v49, %v3210_v36  ;;  %v3525_v53 = vadd.f32 %v7365_v49, %v3141_v11  ;;  %v3212_v38 = vpop.f32.mrb[3].mxu1 }
 0x12f   : > { %3540 = vst [vmem:[%s7370_s12 + $0x40] sm:$0xff] %v3524_v22  ;;  %v3527_v1 = vadd.f32 %v7365_v49, %v3212_v38 }
 0x130   : > { %3542 = vst [vmem:[%s7370_s12 + $0x60] sm:$0xff] %v3526_v12  ;;  %3541 = vst [vmem:[%s7370_s12 + $0x48] sm:$0xff] %v3525_v53 }
 0x131   : > { %v3281_v26 = vpop.f32.mrb[4].mxu0  ;;  %3543 = vst [vmem:[%s7370_s12 + $0x68] sm:$0xff] %v3527_v1 }
 0x132   : > { %v3528_v3 = vadd.f32 %v7365_v49, %v3281_v26  ;;  %v3283_v4 = vpop.f32.mrb[5].mxu0  ;;  %v3352_v62 = vpop.f32.mrb[4].mxu1 }
 0x133   : > { %v3529_v7 = vadd.f32 %v7365_v49, %v3283_v4  ;;  %v3530_v24 = vadd.f32 %v7365_v49, %v3352_v62  ;;  %v3354_v27 = vpop.f32.mrb[5].mxu1 }
 0x134   : > { %3544 = vst [vmem:[%s7370_s12 + $0x80] sm:$0xff] %v3528_v3  ;;  %v3531_v28 = vadd.f32 %v7365_v49, %v3354_v27 }
 0x135   : > { %3545 = vst [vmem:[%s7370_s12 + $0x88] sm:$0xff] %v3529_v7  ;;  %3546 = vst [vmem:[%s7370_s12 + $0xa0] sm:$0xff] %v3530_v24  ;;  %v3423_v18 = vpop.f32.mrb[6].mxu0 }
 0x136   : > { %3547 = vst [vmem:[%s7370_s12 + $0xa8] sm:$0xff] %v3531_v28  ;;  %v3532_v8 = vadd.f32 %v7365_v49, %v3423_v18  ;;  %v3494_v32 = vpop.f32.mrb[6].mxu1  ;;  %v3425_v23 = vpop.f32.mrb[7].mxu0 }
 0x137   : > { %v3534_v17 = vadd.f32 %v7365_v49, %v3494_v32  ;;  %v3533_v25 = vadd.f32 %v7365_v49, %v3425_v23  ;;  %v3496_v48 = vpop.f32.mrb[7].mxu1 }
 0x138   : > { %3548 = vst [vmem:[%s7370_s12 + $0xc0] sm:$0xff] %v3532_v8  ;;  %v3535_v29 = vadd.f32 %v7365_v49, %v3496_v48 }
 0x139   : > { %3550 = vst [vmem:[%s7370_s12 + $0xe0] sm:$0xff] %v3534_v17  ;;  %3549 = vst [vmem:[%s7370_s12 + $0xc8] sm:$0xff] %v3533_v25 }
 0x13a   : > { %3551 = vst [vmem:[%s7370_s12 + $0xe8] sm:$0xff] %v3535_v29 }
 0x169   : > { %v5358_v40 = vpop.f32.mrb[8].mxu0 }
 0x16a   : > { %v5876_v0 = vadd.f32 %v5358_v40, %v7365_v49  ;;  %v5429_v47 = vpop.f32.mrb[8].mxu1  ;;  %v5360_v50 = vpop.f32.mrb[9].mxu0 }
 0x16b   : > { %v5878_v16 = vadd.f32 %v5429_v47, %v7365_v49  ;;  %v5877_v39 = vadd.f32 %v5360_v50, %v7365_v49  ;;  %v5431_v9 = vpop.f32.mrb[9].mxu1 }
 0x16c   : > { %5892 = vst [vmem:[%s7370_s12 + $0x10] sm:$0xff] %v5876_v0  ;;  %v5879_v55 = vadd.f32 %v5431_v9, %v7365_v49 }
 0x16d   : > { %5894 = vst [vmem:[%s7370_s12 + $0x30] sm:$0xff] %v5878_v16  ;;  %5893 = vst [vmem:[%s7370_s12 + $0x18] sm:$0xff] %v5877_v39  ;;  %v5500_v37 = vpop.f32.mrb[10].mxu0 }
 0x16e   : > { %5895 = vst [vmem:[%s7370_s12 + $0x38] sm:$0xff] %v5879_v55  ;;  %v5880_v33 = vadd.f32 %v5500_v37, %v7365_v49  ;;  %v5571_v54 = vpop.f32.mrb[10].mxu1  ;;  %v5502_v2 = vpop.f32.mrb[11].mxu0 }
 0x16f   : > { %v5882_v56 = vadd.f32 %v5571_v54, %v7365_v49  ;;  %v5881_v14 = vadd.f32 %v5502_v2, %v7365_v49  ;;  %v5573_v20 = vpop.f32.mrb[11].mxu1 }
 0x170   : > { %5896 = vst [vmem:[%s7370_s12 + $0x50] sm:$0xff] %v5880_v33  ;;  %v5883_v41 = vadd.f32 %v5573_v20, %v7365_v49 }
 0x171   : > { %5898 = vst [vmem:[%s7370_s12 + $0x70] sm:$0xff] %v5882_v56  ;;  %5897 = vst [vmem:[%s7370_s12 + $0x58] sm:$0xff] %v5881_v14  ;;  %v5642_v42 = vpop.f32.mrb[12].mxu0 }
 0x172   : > { %5899 = vst [vmem:[%s7370_s12 + $0x78] sm:$0xff] %v5883_v41  ;;  %v5884_v45 = vadd.f32 %v5642_v42, %v7365_v49  ;;  %v5713_v46 = vpop.f32.mrb[12].mxu1  ;;  %v5644_v51 = vpop.f32.mrb[13].mxu0 }
 0x173   : > { %v5886_v52 = vadd.f32 %v5713_v46, %v7365_v49  ;;  %v5885_v57 = vadd.f32 %v5644_v51, %v7365_v49  ;;  %v5715_v58 = vpop.f32.mrb[13].mxu1 }
 0x174   : > { %5900 = vst [vmem:[%s7370_s12 + $0x90] sm:$0xff] %v5884_v45  ;;  %v5887_v61 = vadd.f32 %v5715_v58, %v7365_v49 }
 0x175   : > { %5902 = vst [vmem:[%s7370_s12 + $0xb0] sm:$0xff] %v5886_v52  ;;  %5901 = vst [vmem:[%s7370_s12 + $0x98] sm:$0xff] %v5885_v57  ;;  %v5784_v10 = vpop.f32.mrb[14].mxu0 }
 0x176   : > { %5903 = vst [vmem:[%s7370_s12 + $0xb8] sm:$0xff] %v5887_v61  ;;  %v5888_v13 = vadd.f32 %v5784_v10, %v7365_v49  ;;  %v5855_v6 = vpop.f32.mrb[14].mxu1  ;;  %v5786_v5 = vpop.f32.mrb[15].mxu0 }
 0x177   : > { %v5890_v34 = vadd.f32 %v5855_v6, %v7365_v49  ;;  %v5889_v35 = vadd.f32 %v5786_v5, %v7365_v49  ;;  %v5857_v43 = vpop.f32.mrb[15].mxu1 }
 0x178   : > { %5904 = vst [vmem:[%s7370_s12 + $0xd0] sm:$0xff] %v5888_v13  ;;  %v5891_v59 = vadd.f32 %v5857_v43, %v7365_v49 }
 0x179   : > { %5906 = vst [vmem:[%s7370_s12 + $0xf0] sm:$0xff] %v5890_v34  ;;  %5905 = vst [vmem:[%s7370_s12 + $0xd8] sm:$0xff] %v5889_v35 }
 0x17a   : > { %5907 = vst [vmem:[%s7370_s12 + $0xf8] sm:$0xff] %v5891_v59 }
 0x17b PF: > { %s14_s17 = sadd.s32 1, %s6352_s17   ;;  %s7492_s15 = smov %s6348_s16 }
 0x17c   : > { %p11_p5 = scmp.ge.s32.totalorder %s14_s17, 4   ;;  %s7493_s16 = smov %s7495_s18 }
 0x17e   :  { %13 = sbr.rel (!%p11_p5) target bundleno = 2 (0x2), region = 73 }

</bundles_post_ra>
